<compile_context>
chip_gen: v7x
topology: tpu7x:2x2x1
jax: 0.10.0
libtpu: 0.0.40
codegen_flags: <defaults>
</compile_context>

<pallas_src>
import functools

import jax
import jax.numpy as jnp
from jax.experimental import pallas as pl
from jax.experimental.pallas import tpu as pltpu


# ----------------------------------------------------------------------------
# Fused Pallas kernel
# ----------------------------------------------------------------------------
def fused_gat_model_kernel(nf_ref, embw_ref, embb_ref, bias_ref,
                           w1_ref, a1_ref, g1_ref, b1_ref,
                           w2_ref, a2_ref, g2_ref, b2_ref,
                           mw1_ref, mb1_ref, mw2_ref, mb2_ref,
                           out_ref, *, n_heads, out_features, alpha, eps,
                           inv_num_nodes):
    H = n_heads
    F = out_features
    head_scale = 1.0 / n_heads

    # Additive softmax mask (0 on edges incl. self-loops, -1e10 elsewhere),
    # shared by both GAT layers and all heads.
    bias = bias_ref[...].astype(jnp.float32)                      # [N, N]

    # node_emb: Linear(1, Din) as a broadcast outer product (no matmul needed).
    x = nf_ref[...] * embw_ref[...] + embb_ref[...]               # [N, Din] f32

    def gat_layer(x_in, w_ref, a_ref):
        # bf16 MXU feeds, f32 accumulation.
        wh = jnp.dot(x_in.astype(jnp.bfloat16), w_ref[...],
                     preferred_element_type=jnp.float32)          # [N, H*F]
        wh_b = wh.astype(jnp.bfloat16)

        # All-head attention scores with ONE K = H*F matmul against the
        # block-diagonal attention matrix:
        #   s[:, h]   = Wh_h @ a[:F]   (query term)
        #   s[:, H+h] = Wh_h @ a[F:]   (neighbor term)
        s = jnp.dot(wh_b, a_ref[...], preferred_element_type=jnp.float32)  # [N, 2H]
        st = s.T                                                  # [2H, N] tiny transpose

        p_blocks = []
        for h in range(H):        # static unroll: H=4, toy N (see TODO above)
            # e[i, j] = leakyrelu(s1[i] + s2[j]) + mask_bias[i, j]
            e = s[:, h:h + 1] + st[H + h:H + h + 1, :]            # [N, N]
            e = jnp.where(e > 0, e, alpha * e)                    # LeakyReLU
            e = e + bias                                          # additive -1e10 mask
            e = e - jnp.max(e, axis=1, keepdims=True)
            p = jnp.exp(e)
            inv = pl.reciprocal(jnp.sum(p, axis=1, keepdims=True), approx=True)
            # fold the 1/n_heads head-mean into the softmax normalization
            p_blocks.append(p * (inv * head_scale))
        # TODO(synk): attention dropout (p=0.6) skipped -- inference semantics.

        # Batched neighbor aggregation: one [N, H*N] @ [H*N, F] matmul (K = H*N)
        # instead of H underfilled K = N dots.
        p_cat = jnp.concatenate(p_blocks, axis=1).astype(jnp.bfloat16)     # [N, H*N]
        wh_stack = jnp.concatenate(
            [wh_b[:, h * F:(h + 1) * F] for h in range(H)], axis=0)        # [H*N, F]
        return jnp.dot(p_cat, wh_stack, preferred_element_type=jnp.float32)  # [N, F]

    def ln_relu(v, g_ref, b_ref):
        mu = jnp.mean(v, axis=-1, keepdims=True)
        var = jnp.mean(jnp.square(v - mu), axis=-1, keepdims=True)
        y = (v - mu) * jax.lax.rsqrt(var + eps)
        return jnp.maximum(y * g_ref[...] + b_ref[...], 0.0)

    h1 = ln_relu(gat_layer(x, w1_ref, a1_ref), g1_ref, b1_ref)    # [N, F]
    # TODO(synk): F.dropout(p=0.6) between layers skipped -- inference semantics.
    h2 = ln_relu(gat_layer(h1, w2_ref, a2_ref), g2_ref, b2_ref)   # [N, F]

    # JumpingKnowledge 'cat' + global_mean_pool + MLP head.
    h = jnp.concatenate([h1, h2], axis=-1)                        # [N, 2F]
    pooled = jnp.sum(h, axis=0, keepdims=True) * inv_num_nodes    # [1, 2F]
    z = jnp.maximum(
        jnp.dot(pooled, mw1_ref[...], preferred_element_type=jnp.float32)
        + mb1_ref[...], 0.0)
    out_ref[...] = (jnp.dot(z, mw2_ref[...], preferred_element_type=jnp.float32)
                    + mb2_ref[...])


# ----------------------------------------------------------------------------
# Wrapper
# ----------------------------------------------------------------------------
def build_head_attention_matrix(a, n_heads, out_features):
    """a: [2F, 1] (shared across heads) -> block-diagonal [H*F, 2H] matrix so that
    Wh @ A yields all per-head (s1, s2) attention terms in one matmul."""
    F = out_features
    a1 = a[:F, 0]
    a2 = a[F:, 0]
    A = jnp.zeros((n_heads * F, 2 * n_heads), jnp.float32)
    for h in range(n_heads):
        A = A.at[h * F:(h + 1) * F, h].set(a1)
        A = A.at[h * F:(h + 1) * F, n_heads + h].set(a2)
    return A


def gat_adj_model_pallas(params, nf, mask_bias, *, n_heads, hidden_dim,
                         alpha=0.2, eps=1e-5):
    N = nf.shape[0]
    Din = params["emb_w"].shape[1]
    F = hidden_dim
    H = n_heads
    output_dim = params["mlp_w2"].shape[1]

    args = [
        nf.astype(jnp.float32),                                    # [N, 1]
        params["emb_w"].reshape(1, Din),                           # [1, Din]
        params["emb_b"].reshape(1, Din),                           # [1, Din]
        mask_bias,                                                 # [N, N] bf16
        params["gat1_W"].astype(jnp.bfloat16),                     # [Din, H*F]
        build_head_attention_matrix(params["gat1_a"], H, F).astype(jnp.bfloat16),
        params["norm1_g"].reshape(1, F),
        params["norm1_b"].reshape(1, F),
        params["gat2_W"].astype(jnp.bfloat16),                     # [F, H*F]
        build_head_attention_matrix(params["gat2_a"], H, F).astype(jnp.bfloat16),
        params["norm2_g"].reshape(1, F),
        params["norm2_b"].reshape(1, F),
        params["mlp_w1"],                                          # [2F, F]
        params["mlp_b1"].reshape(1, F),
        params["mlp_w2"],                                          # [F, out]
        params["mlp_b2"].reshape(1, output_dim),
    ]

    kernel = functools.partial(
        fused_gat_model_kernel, n_heads=H, out_features=F, alpha=alpha,
        eps=eps, inv_num_nodes=1.0 / N)

    in_specs = [pl.BlockSpec(a.shape, lambda i: (0, 0)) for a in args]

    return pl.pallas_call(
        kernel,
        out_shape=jax.ShapeDtypeStruct((1, output_dim), jnp.float32),
        grid=(1,),
        in_specs=in_specs,
        out_specs=pl.BlockSpec((1, output_dim), lambda i: (0, 0)),
        compiler_params=pltpu.CompilerParams(
            dimension_semantics=("arbitrary",)),
    )(*args)


# ----------------------------------------------------------------------------
# Parameters (deterministic init, mirrors the PyTorch __init__ shapes)
# ----------------------------------------------------------------------------
def xavier_uniform(key, shape):
    fan_in, fan_out = shape[0], shape[1]
    limit = (6.0 / (fan_in + fan_out)) ** 0.5
    return jax.random.uniform(key, shape, jnp.float32, -limit, limit)


def init_params(key, input_dim, hidden_dim, output_dim, n_heads):
    ks = jax.random.split(key, 8)
    p = {}
    p["emb_w"] = xavier_uniform(ks[0], (1, input_dim))            # nn.Linear(1, input_dim)
    p["emb_b"] = jnp.zeros((input_dim,), jnp.float32)
    p["gat1_W"] = xavier_uniform(ks[1], (input_dim, n_heads * hidden_dim))
    p["gat1_a"] = xavier_uniform(ks[2], (2 * hidden_dim, 1))
    p["norm1_g"] = jnp.ones((hidden_dim,), jnp.float32)
    p["norm1_b"] = jnp.zeros((hidden_dim,), jnp.float32)
    p["gat2_W"] = xavier_uniform(ks[3], (hidden_dim, n_heads * hidden_dim))
    p["gat2_a"] = xavier_uniform(ks[4], (2 * hidden_dim, 1))
    p["norm2_g"] = jnp.ones((hidden_dim,), jnp.float32)
    p["norm2_b"] = jnp.zeros((hidden_dim,), jnp.float32)
    p["mlp_w1"] = xavier_uniform(ks[5], (2 * hidden_dim, hidden_dim))
    p["mlp_b1"] = jnp.zeros((hidden_dim,), jnp.float32)
    p["mlp_w2"] = xavier_uniform(ks[6], (hidden_dim, output_dim))
    p["mlp_b2"] = jnp.zeros((output_dim,), jnp.float32)
    return p


# ----------------------------------------------------------------------------
# Full model forward (single graph, batch = zeros)
# ----------------------------------------------------------------------------
def gat_adj_model_forward(params, edge_index, num_nodes, *, n_heads, hidden_dim):
    row, col = edge_index[0], edge_index[1]

    # get_neighborhood_features (reproduced exactly, incl. indexing by `row`)
    deg = jnp.zeros((num_nodes,), jnp.float32).at[col].add(1.0)    # degree(col)
    neighbor_degrees = deg[row]
    summed = jnp.zeros((num_nodes,), jnp.float32).at[row].add(neighbor_degrees)
    mean_nb = summed / jnp.maximum(deg, 1.0)
    nf = mean_nb[:, None]                                          # [N, 1]

    # add_self_loops + to_dense_adj (single graph) -> additive bf16 softmax mask,
    # built once and reused by both GAT layers and all heads inside the kernel.
    sl = jnp.arange(num_nodes, dtype=edge_index.dtype)
    rows = jnp.concatenate([row, sl])
    cols = jnp.concatenate([col, sl])
    adj = jnp.zeros((num_nodes, num_nodes), jnp.float32).at[rows, cols].add(1.0)
    mask_bias = jnp.where(adj > 0, 0.0, -1e10).astype(jnp.bfloat16)

    return gat_adj_model_pallas(params, nf, mask_bias,
                                n_heads=n_heads, hidden_dim=hidden_dim)


# ----------------------------------------------------------------------------
if __name__ == "__main__":
    key = jax.random.PRNGKey(0)

    num_nodes = 32
    input_dim, hidden_dim, output_dim, n_heads = 16, 32, 4, 4

    # deterministic small graph: bidirectional ring (2*N edges)
    src = jnp.arange(num_nodes, dtype=jnp.int32)
    dst = (src + 1) % num_nodes
    edge_index = jnp.stack([jnp.concatenate([src, dst]),
                            jnp.concatenate([dst, src])])          # [2, 64]

    params = init_params(key, input_dim, hidden_dim, output_dim, n_heads)

    out = gat_adj_model_forward(params, edge_index, num_nodes,
                                n_heads=n_heads, hidden_dim=hidden_dim)
    jax.block_until_ready(out)
    assert out.shape == (1, output_dim)
    print("KERNEL_OK")
</pallas_src>

<mosaic_0001>
module attributes {stable_mosaic.version = 11 : i64} {
  func.func @fused_gat_model_kernel(%arg0: i32, %arg1: memref<32x1xf32, #tpu.memory_space<vmem>>, %arg2: memref<1x16xf32, #tpu.memory_space<vmem>>, %arg3: memref<1x16xf32, #tpu.memory_space<vmem>>, %arg4: memref<32x32xbf16, #tpu.memory_space<vmem>>, %arg5: memref<16x128xbf16, #tpu.memory_space<vmem>>, %arg6: memref<128x8xbf16, #tpu.memory_space<vmem>>, %arg7: memref<1x32xf32, #tpu.memory_space<vmem>>, %arg8: memref<1x32xf32, #tpu.memory_space<vmem>>, %arg9: memref<32x128xbf16, #tpu.memory_space<vmem>>, %arg10: memref<128x8xbf16, #tpu.memory_space<vmem>>, %arg11: memref<1x32xf32, #tpu.memory_space<vmem>>, %arg12: memref<1x32xf32, #tpu.memory_space<vmem>>, %arg13: memref<64x32xf32, #tpu.memory_space<vmem>>, %arg14: memref<1x32xf32, #tpu.memory_space<vmem>>, %arg15: memref<32x4xf32, #tpu.memory_space<vmem>>, %arg16: memref<1x4xf32, #tpu.memory_space<vmem>>, %arg17: memref<1x4xf32, #tpu.memory_space<vmem>>) attributes {dimension_semantics = [#tpu.dimension_semantics<arbitrary>], iteration_bounds = array<i64: 1>, scalar_prefetch = 0 : i64, scratch_operands = 0 : i64, tpu.core_type = #tpu.core_type<tc>, window_params = [{pipeline_mode = #tpu.pipeline_mode<synchronous>, transform_indices = @transform_0, window_bounds = array<i64: 32, 1>}, {pipeline_mode = #tpu.pipeline_mode<synchronous>, transform_indices = @transform_1, window_bounds = array<i64: 1, 16>}, {pipeline_mode = #tpu.pipeline_mode<synchronous>, transform_indices = @transform_2, window_bounds = array<i64: 1, 16>}, {pipeline_mode = #tpu.pipeline_mode<synchronous>, transform_indices = @transform_3, window_bounds = array<i64: 32, 32>}, {pipeline_mode = #tpu.pipeline_mode<synchronous>, transform_indices = @transform_4, window_bounds = array<i64: 16, 128>}, {pipeline_mode = #tpu.pipeline_mode<synchronous>, transform_indices = @transform_5, window_bounds = array<i64: 128, 8>}, {pipeline_mode = #tpu.pipeline_mode<synchronous>, transform_indices = @transform_6, window_bounds = array<i64: 1, 32>}, {pipeline_mode = #tpu.pipeline_mode<synchronous>, transform_indices = @transform_7, window_bounds = array<i64: 1, 32>}, {pipeline_mode = #tpu.pipeline_mode<synchronous>, transform_indices = @transform_8, window_bounds = array<i64: 32, 128>}, {pipeline_mode = #tpu.pipeline_mode<synchronous>, transform_indices = @transform_9, window_bounds = array<i64: 128, 8>}, {pipeline_mode = #tpu.pipeline_mode<synchronous>, transform_indices = @transform_10, window_bounds = array<i64: 1, 32>}, {pipeline_mode = #tpu.pipeline_mode<synchronous>, transform_indices = @transform_11, window_bounds = array<i64: 1, 32>}, {pipeline_mode = #tpu.pipeline_mode<synchronous>, transform_indices = @transform_12, window_bounds = array<i64: 64, 32>}, {pipeline_mode = #tpu.pipeline_mode<synchronous>, transform_indices = @transform_13, window_bounds = array<i64: 1, 32>}, {pipeline_mode = #tpu.pipeline_mode<synchronous>, transform_indices = @transform_14, window_bounds = array<i64: 32, 4>}, {pipeline_mode = #tpu.pipeline_mode<synchronous>, transform_indices = @transform_15, window_bounds = array<i64: 1, 4>}, {pipeline_mode = #tpu.pipeline_mode<synchronous>, transform_indices = @transform_16, window_bounds = array<i64: 1, 4>}]} {
    %c0 = arith.constant 0 : index
    %c0_0 = arith.constant 0 : index
    %0 = vector.load %arg4[%c0, %c0_0] : memref<32x32xbf16, #tpu.memory_space<vmem>>, vector<32x32xbf16>
    %1 = arith.extf %0 : vector<32x32xbf16> to vector<32x32xf32>
    %c0_1 = arith.constant 0 : index
    %c0_2 = arith.constant 0 : index
    %2 = vector.load %arg1[%c0_1, %c0_2] : memref<32x1xf32, #tpu.memory_space<vmem>>, vector<32x1xf32>
    %c0_3 = arith.constant 0 : index
    %c0_4 = arith.constant 0 : index
    %3 = vector.load %arg2[%c0_3, %c0_4] : memref<1x16xf32, #tpu.memory_space<vmem>>, vector<1x16xf32>
    %4 = vector.broadcast %2 : vector<32x1xf32> to vector<32x16xf32>
    %5 = vector.broadcast %3 : vector<1x16xf32> to vector<32x16xf32>
    %6 = arith.mulf %4, %5 : vector<32x16xf32>
    %c0_5 = arith.constant 0 : index
    %c0_6 = arith.constant 0 : index
    %7 = vector.load %arg3[%c0_5, %c0_6] : memref<1x16xf32, #tpu.memory_space<vmem>>, vector<1x16xf32>
    %8 = vector.broadcast %7 : vector<1x16xf32> to vector<32x16xf32>
    %9 = arith.addf %6, %8 : vector<32x16xf32>
    %10 = arith.truncf %9 : vector<32x16xf32> to vector<32x16xbf16>
    %c0_7 = arith.constant 0 : index
    %c0_8 = arith.constant 0 : index
    %11 = vector.load %arg5[%c0_7, %c0_8] : memref<16x128xbf16, #tpu.memory_space<vmem>>, vector<16x128xbf16>
    %cst = arith.constant dense<0.000000e+00> : vector<32x128xf32>
    %12 = tpu.matmul %10, %11, %cst {dimension_numbers = #tpu.dot_dimension_numbers<[1], [0], [0], [1], [0, 0, 1, 1], [], []>} : vector<32x16xbf16>, vector<16x128xbf16>, vector<32x128xf32> -> vector<32x128xf32>
    %13 = arith.truncf %12 : vector<32x128xf32> to vector<32x128xbf16>
    %c0_9 = arith.constant 0 : index
    %c0_10 = arith.constant 0 : index
    %14 = vector.load %arg6[%c0_9, %c0_10] : memref<128x8xbf16, #tpu.memory_space<vmem>>, vector<128x8xbf16>
    %cst_11 = arith.constant dense<0.000000e+00> : vector<32x8xf32>
    %15 = tpu.matmul %13, %14, %cst_11 {dimension_numbers = #tpu.dot_dimension_numbers<[1], [0], [0], [1], [0, 0, 1, 1], [], []>} : vector<32x128xbf16>, vector<128x8xbf16>, vector<32x8xf32> -> vector<32x8xf32>
    %16 = tpu.transpose %15, [1, 0] : vector<32x8xf32> -> vector<8x32xf32>
    %17 = vector.extract_strided_slice %15 {offsets = [0, 0], sizes = [32, 1], strides = [1, 1]} : vector<32x8xf32> to vector<32x1xf32>
    %18 = vector.extract_strided_slice %16 {offsets = [4, 0], sizes = [1, 32], strides = [1, 1]} : vector<8x32xf32> to vector<1x32xf32>
    %19 = vector.broadcast %17 : vector<32x1xf32> to vector<32x32xf32>
    %20 = vector.broadcast %18 : vector<1x32xf32> to vector<32x32xf32>
    %21 = arith.addf %19, %20 : vector<32x32xf32>
    %cst_12 = arith.constant 0.000000e+00 : f32
    %22 = vector.broadcast %cst_12 : f32 to vector<32x32xf32>
    %23 = arith.cmpf ogt, %21, %22 : vector<32x32xf32>
    %cst_13 = arith.constant 2.000000e-01 : f32
    %24 = vector.broadcast %cst_13 : f32 to vector<32x32xf32>
    %25 = arith.mulf %24, %21 : vector<32x32xf32>
    %26 = arith.select %23, %21, %25 : vector<32x32xi1>, vector<32x32xf32>
    %27 = arith.addf %26, %1 : vector<32x32xf32>
    %cst_14 = arith.constant dense<0xFF800000> : vector<32xf32>
    %28 = vector.multi_reduction <maximumf>, %27, %cst_14 [1] : vector<32x32xf32> to vector<32xf32>
    %29 = vector.shape_cast %28 : vector<32xf32> to vector<32x1xf32>
    %30 = vector.broadcast %29 : vector<32x1xf32> to vector<32x32xf32>
    %31 = arith.subf %27, %30 : vector<32x32xf32>
    %32 = math.exp %31 : vector<32x32xf32>
    %cst_15 = arith.constant dense<0.000000e+00> : vector<32xf32>
    %33 = vector.multi_reduction <add>, %32, %cst_15 [1] : vector<32x32xf32> to vector<32xf32>
    %34 = vector.shape_cast %33 : vector<32xf32> to vector<32x1xf32>
    %35 = tpu.reciprocal %34 {approx = true} : vector<32x1xf32> -> vector<32x1xf32>
    %cst_16 = arith.constant 2.500000e-01 : f32
    %36 = vector.broadcast %cst_16 : f32 to vector<32x1xf32>
    %37 = arith.mulf %35, %36 : vector<32x1xf32>
    %38 = vector.broadcast %37 : vector<32x1xf32> to vector<32x32xf32>
    %39 = arith.mulf %32, %38 : vector<32x32xf32>
    %40 = vector.extract_strided_slice %15 {offsets = [0, 1], sizes = [32, 1], strides = [1, 1]} : vector<32x8xf32> to vector<32x1xf32>
    %41 = vector.extract_strided_slice %16 {offsets = [5, 0], sizes = [1, 32], strides = [1, 1]} : vector<8x32xf32> to vector<1x32xf32>
    %42 = vector.broadcast %40 : vector<32x1xf32> to vector<32x32xf32>
    %43 = vector.broadcast %41 : vector<1x32xf32> to vector<32x32xf32>
    %44 = arith.addf %42, %43 : vector<32x32xf32>
    %cst_17 = arith.constant 0.000000e+00 : f32
    %45 = vector.broadcast %cst_17 : f32 to vector<32x32xf32>
    %46 = arith.cmpf ogt, %44, %45 : vector<32x32xf32>
    %cst_18 = arith.constant 2.000000e-01 : f32
    %47 = vector.broadcast %cst_18 : f32 to vector<32x32xf32>
    %48 = arith.mulf %47, %44 : vector<32x32xf32>
    %49 = arith.select %46, %44, %48 : vector<32x32xi1>, vector<32x32xf32>
    %50 = arith.addf %49, %1 : vector<32x32xf32>
    %cst_19 = arith.constant dense<0xFF800000> : vector<32xf32>
    %51 = vector.multi_reduction <maximumf>, %50, %cst_19 [1] : vector<32x32xf32> to vector<32xf32>
    %52 = vector.shape_cast %51 : vector<32xf32> to vector<32x1xf32>
    %53 = vector.broadcast %52 : vector<32x1xf32> to vector<32x32xf32>
    %54 = arith.subf %50, %53 : vector<32x32xf32>
    %55 = math.exp %54 : vector<32x32xf32>
    %cst_20 = arith.constant dense<0.000000e+00> : vector<32xf32>
    %56 = vector.multi_reduction <add>, %55, %cst_20 [1] : vector<32x32xf32> to vector<32xf32>
    %57 = vector.shape_cast %56 : vector<32xf32> to vector<32x1xf32>
    %58 = tpu.reciprocal %57 {approx = true} : vector<32x1xf32> -> vector<32x1xf32>
    %cst_21 = arith.constant 2.500000e-01 : f32
    %59 = vector.broadcast %cst_21 : f32 to vector<32x1xf32>
    %60 = arith.mulf %58, %59 : vector<32x1xf32>
    %61 = vector.broadcast %60 : vector<32x1xf32> to vector<32x32xf32>
    %62 = arith.mulf %55, %61 : vector<32x32xf32>
    %63 = vector.extract_strided_slice %15 {offsets = [0, 2], sizes = [32, 1], strides = [1, 1]} : vector<32x8xf32> to vector<32x1xf32>
    %64 = vector.extract_strided_slice %16 {offsets = [6, 0], sizes = [1, 32], strides = [1, 1]} : vector<8x32xf32> to vector<1x32xf32>
    %65 = vector.broadcast %63 : vector<32x1xf32> to vector<32x32xf32>
    %66 = vector.broadcast %64 : vector<1x32xf32> to vector<32x32xf32>
    %67 = arith.addf %65, %66 : vector<32x32xf32>
    %cst_22 = arith.constant 0.000000e+00 : f32
    %68 = vector.broadcast %cst_22 : f32 to vector<32x32xf32>
    %69 = arith.cmpf ogt, %67, %68 : vector<32x32xf32>
    %cst_23 = arith.constant 2.000000e-01 : f32
    %70 = vector.broadcast %cst_23 : f32 to vector<32x32xf32>
    %71 = arith.mulf %70, %67 : vector<32x32xf32>
    %72 = arith.select %69, %67, %71 : vector<32x32xi1>, vector<32x32xf32>
    %73 = arith.addf %72, %1 : vector<32x32xf32>
    %cst_24 = arith.constant dense<0xFF800000> : vector<32xf32>
    %74 = vector.multi_reduction <maximumf>, %73, %cst_24 [1] : vector<32x32xf32> to vector<32xf32>
    %75 = vector.shape_cast %74 : vector<32xf32> to vector<32x1xf32>
    %76 = vector.broadcast %75 : vector<32x1xf32> to vector<32x32xf32>
    %77 = arith.subf %73, %76 : vector<32x32xf32>
    %78 = math.exp %77 : vector<32x32xf32>
    %cst_25 = arith.constant dense<0.000000e+00> : vector<32xf32>
    %79 = vector.multi_reduction <add>, %78, %cst_25 [1] : vector<32x32xf32> to vector<32xf32>
    %80 = vector.shape_cast %79 : vector<32xf32> to vector<32x1xf32>
    %81 = tpu.reciprocal %80 {approx = true} : vector<32x1xf32> -> vector<32x1xf32>
    %cst_26 = arith.constant 2.500000e-01 : f32
    %82 = vector.broadcast %cst_26 : f32 to vector<32x1xf32>
    %83 = arith.mulf %81, %82 : vector<32x1xf32>
    %84 = vector.broadcast %83 : vector<32x1xf32> to vector<32x32xf32>
    %85 = arith.mulf %78, %84 : vector<32x32xf32>
    %86 = vector.extract_strided_slice %15 {offsets = [0, 3], sizes = [32, 1], strides = [1, 1]} : vector<32x8xf32> to vector<32x1xf32>
    %87 = vector.extract_strided_slice %16 {offsets = [7, 0], sizes = [1, 32], strides = [1, 1]} : vector<8x32xf32> to vector<1x32xf32>
    %88 = vector.broadcast %86 : vector<32x1xf32> to vector<32x32xf32>
    %89 = vector.broadcast %87 : vector<1x32xf32> to vector<32x32xf32>
    %90 = arith.addf %88, %89 : vector<32x32xf32>
    %cst_27 = arith.constant 0.000000e+00 : f32
    %91 = vector.broadcast %cst_27 : f32 to vector<32x32xf32>
    %92 = arith.cmpf ogt, %90, %91 : vector<32x32xf32>
    %cst_28 = arith.constant 2.000000e-01 : f32
    %93 = vector.broadcast %cst_28 : f32 to vector<32x32xf32>
    %94 = arith.mulf %93, %90 : vector<32x32xf32>
    %95 = arith.select %92, %90, %94 : vector<32x32xi1>, vector<32x32xf32>
    %96 = arith.addf %95, %1 : vector<32x32xf32>
    %cst_29 = arith.constant dense<0xFF800000> : vector<32xf32>
    %97 = vector.multi_reduction <maximumf>, %96, %cst_29 [1] : vector<32x32xf32> to vector<32xf32>
    %98 = vector.shape_cast %97 : vector<32xf32> to vector<32x1xf32>
    %99 = vector.broadcast %98 : vector<32x1xf32> to vector<32x32xf32>
    %100 = arith.subf %96, %99 : vector<32x32xf32>
    %101 = math.exp %100 : vector<32x32xf32>
    %cst_30 = arith.constant dense<0.000000e+00> : vector<32xf32>
    %102 = vector.multi_reduction <add>, %101, %cst_30 [1] : vector<32x32xf32> to vector<32xf32>
    %103 = vector.shape_cast %102 : vector<32xf32> to vector<32x1xf32>
    %104 = tpu.reciprocal %103 {approx = true} : vector<32x1xf32> -> vector<32x1xf32>
    %cst_31 = arith.constant 2.500000e-01 : f32
    %105 = vector.broadcast %cst_31 : f32 to vector<32x1xf32>
    %106 = arith.mulf %104, %105 : vector<32x1xf32>
    %107 = vector.broadcast %106 : vector<32x1xf32> to vector<32x32xf32>
    %108 = arith.mulf %101, %107 : vector<32x32xf32>
    %109 = tpu.concatenate %39, %62, %85, %108 in 1 : vector<32x32xf32>, vector<32x32xf32>, vector<32x32xf32>, vector<32x32xf32> -> vector<32x128xf32>
    %110 = arith.truncf %109 : vector<32x128xf32> to vector<32x128xbf16>
    %111 = vector.extract_strided_slice %13 {offsets = [0, 0], sizes = [32, 32], strides = [1, 1]} : vector<32x128xbf16> to vector<32x32xbf16>
    %112 = vector.extract_strided_slice %13 {offsets = [0, 32], sizes = [32, 32], strides = [1, 1]} : vector<32x128xbf16> to vector<32x32xbf16>
    %113 = vector.extract_strided_slice %13 {offsets = [0, 64], sizes = [32, 32], strides = [1, 1]} : vector<32x128xbf16> to vector<32x32xbf16>
    %114 = vector.extract_strided_slice %13 {offsets = [0, 96], sizes = [32, 32], strides = [1, 1]} : vector<32x128xbf16> to vector<32x32xbf16>
    %115 = tpu.concatenate %111, %112, %113, %114 in 0 : vector<32x32xbf16>, vector<32x32xbf16>, vector<32x32xbf16>, vector<32x32xbf16> -> vector<128x32xbf16>
    %cst_32 = arith.constant dense<0.000000e+00> : vector<32x32xf32>
    %116 = tpu.matmul %110, %115, %cst_32 {dimension_numbers = #tpu.dot_dimension_numbers<[1], [0], [0], [1], [0, 0, 1, 1], [], []>} : vector<32x128xbf16>, vector<128x32xbf16>, vector<32x32xf32> -> vector<32x32xf32>
    %cst_33 = arith.constant dense<0.000000e+00> : vector<32xf32>
    %117 = vector.multi_reduction <add>, %116, %cst_33 [1] : vector<32x32xf32> to vector<32xf32>
    %118 = vector.shape_cast %117 : vector<32xf32> to vector<32x1xf32>
    %cst_34 = arith.constant 3.200000e+01 : f32
    %119 = vector.broadcast %cst_34 : f32 to vector<32x1xf32>
    %120 = arith.divf %118, %119 : vector<32x1xf32>
    %121 = vector.broadcast %120 : vector<32x1xf32> to vector<32x32xf32>
    %122 = arith.subf %116, %121 : vector<32x32xf32>
    %123 = arith.mulf %122, %122 : vector<32x32xf32>
    %cst_35 = arith.constant dense<0.000000e+00> : vector<32xf32>
    %124 = vector.multi_reduction <add>, %123, %cst_35 [1] : vector<32x32xf32> to vector<32xf32>
    %125 = vector.shape_cast %124 : vector<32xf32> to vector<32x1xf32>
    %cst_36 = arith.constant 3.200000e+01 : f32
    %126 = vector.broadcast %cst_36 : f32 to vector<32x1xf32>
    %127 = arith.divf %125, %126 : vector<32x1xf32>
    %128 = vector.broadcast %120 : vector<32x1xf32> to vector<32x32xf32>
    %129 = arith.subf %116, %128 : vector<32x32xf32>
    %cst_37 = arith.constant 9.99999974E-6 : f32
    %130 = vector.broadcast %cst_37 : f32 to vector<32x1xf32>
    %131 = arith.addf %127, %130 : vector<32x1xf32>
    %132 = math.rsqrt %131 : vector<32x1xf32>
    %133 = vector.broadcast %132 : vector<32x1xf32> to vector<32x32xf32>
    %134 = arith.mulf %129, %133 : vector<32x32xf32>
    %c0_38 = arith.constant 0 : index
    %c0_39 = arith.constant 0 : index
    %135 = vector.load %arg7[%c0_38, %c0_39] : memref<1x32xf32, #tpu.memory_space<vmem>>, vector<1x32xf32>
    %136 = vector.broadcast %135 : vector<1x32xf32> to vector<32x32xf32>
    %137 = arith.mulf %134, %136 : vector<32x32xf32>
    %c0_40 = arith.constant 0 : index
    %c0_41 = arith.constant 0 : index
    %138 = vector.load %arg8[%c0_40, %c0_41] : memref<1x32xf32, #tpu.memory_space<vmem>>, vector<1x32xf32>
    %139 = vector.broadcast %138 : vector<1x32xf32> to vector<32x32xf32>
    %140 = arith.addf %137, %139 : vector<32x32xf32>
    %cst_42 = arith.constant 0.000000e+00 : f32
    %141 = vector.broadcast %cst_42 : f32 to vector<32x32xf32>
    %142 = arith.maximumf %140, %141 : vector<32x32xf32>
    %143 = arith.truncf %142 : vector<32x32xf32> to vector<32x32xbf16>
    %c0_43 = arith.constant 0 : index
    %c0_44 = arith.constant 0 : index
    %144 = vector.load %arg9[%c0_43, %c0_44] : memref<32x128xbf16, #tpu.memory_space<vmem>>, vector<32x128xbf16>
    %cst_45 = arith.constant dense<0.000000e+00> : vector<32x128xf32>
    %145 = tpu.matmul %143, %144, %cst_45 {dimension_numbers = #tpu.dot_dimension_numbers<[1], [0], [0], [1], [0, 0, 1, 1], [], []>} : vector<32x32xbf16>, vector<32x128xbf16>, vector<32x128xf32> -> vector<32x128xf32>
    %146 = arith.truncf %145 : vector<32x128xf32> to vector<32x128xbf16>
    %c0_46 = arith.constant 0 : index
    %c0_47 = arith.constant 0 : index
    %147 = vector.load %arg10[%c0_46, %c0_47] : memref<128x8xbf16, #tpu.memory_space<vmem>>, vector<128x8xbf16>
    %cst_48 = arith.constant dense<0.000000e+00> : vector<32x8xf32>
    %148 = tpu.matmul %146, %147, %cst_48 {dimension_numbers = #tpu.dot_dimension_numbers<[1], [0], [0], [1], [0, 0, 1, 1], [], []>} : vector<32x128xbf16>, vector<128x8xbf16>, vector<32x8xf32> -> vector<32x8xf32>
    %149 = tpu.transpose %148, [1, 0] : vector<32x8xf32> -> vector<8x32xf32>
    %150 = vector.extract_strided_slice %148 {offsets = [0, 0], sizes = [32, 1], strides = [1, 1]} : vector<32x8xf32> to vector<32x1xf32>
    %151 = vector.extract_strided_slice %149 {offsets = [4, 0], sizes = [1, 32], strides = [1, 1]} : vector<8x32xf32> to vector<1x32xf32>
    %152 = vector.broadcast %150 : vector<32x1xf32> to vector<32x32xf32>
    %153 = vector.broadcast %151 : vector<1x32xf32> to vector<32x32xf32>
    %154 = arith.addf %152, %153 : vector<32x32xf32>
    %cst_49 = arith.constant 0.000000e+00 : f32
    %155 = vector.broadcast %cst_49 : f32 to vector<32x32xf32>
    %156 = arith.cmpf ogt, %154, %155 : vector<32x32xf32>
    %cst_50 = arith.constant 2.000000e-01 : f32
    %157 = vector.broadcast %cst_50 : f32 to vector<32x32xf32>
    %158 = arith.mulf %157, %154 : vector<32x32xf32>
    %159 = arith.select %156, %154, %158 : vector<32x32xi1>, vector<32x32xf32>
    %160 = arith.addf %159, %1 : vector<32x32xf32>
    %cst_51 = arith.constant dense<0xFF800000> : vector<32xf32>
    %161 = vector.multi_reduction <maximumf>, %160, %cst_51 [1] : vector<32x32xf32> to vector<32xf32>
    %162 = vector.shape_cast %161 : vector<32xf32> to vector<32x1xf32>
    %163 = vector.broadcast %162 : vector<32x1xf32> to vector<32x32xf32>
    %164 = arith.subf %160, %163 : vector<32x32xf32>
    %165 = math.exp %164 : vector<32x32xf32>
    %cst_52 = arith.constant dense<0.000000e+00> : vector<32xf32>
    %166 = vector.multi_reduction <add>, %165, %cst_52 [1] : vector<32x32xf32> to vector<32xf32>
    %167 = vector.shape_cast %166 : vector<32xf32> to vector<32x1xf32>
    %168 = tpu.reciprocal %167 {approx = true} : vector<32x1xf32> -> vector<32x1xf32>
    %cst_53 = arith.constant 2.500000e-01 : f32
    %169 = vector.broadcast %cst_53 : f32 to vector<32x1xf32>
    %170 = arith.mulf %168, %169 : vector<32x1xf32>
    %171 = vector.broadcast %170 : vector<32x1xf32> to vector<32x32xf32>
    %172 = arith.mulf %165, %171 : vector<32x32xf32>
    %173 = vector.extract_strided_slice %148 {offsets = [0, 1], sizes = [32, 1], strides = [1, 1]} : vector<32x8xf32> to vector<32x1xf32>
    %174 = vector.extract_strided_slice %149 {offsets = [5, 0], sizes = [1, 32], strides = [1, 1]} : vector<8x32xf32> to vector<1x32xf32>
    %175 = vector.broadcast %173 : vector<32x1xf32> to vector<32x32xf32>
    %176 = vector.broadcast %174 : vector<1x32xf32> to vector<32x32xf32>
    %177 = arith.addf %175, %176 : vector<32x32xf32>
    %cst_54 = arith.constant 0.000000e+00 : f32
    %178 = vector.broadcast %cst_54 : f32 to vector<32x32xf32>
    %179 = arith.cmpf ogt, %177, %178 : vector<32x32xf32>
    %cst_55 = arith.constant 2.000000e-01 : f32
    %180 = vector.broadcast %cst_55 : f32 to vector<32x32xf32>
    %181 = arith.mulf %180, %177 : vector<32x32xf32>
    %182 = arith.select %179, %177, %181 : vector<32x32xi1>, vector<32x32xf32>
    %183 = arith.addf %182, %1 : vector<32x32xf32>
    %cst_56 = arith.constant dense<0xFF800000> : vector<32xf32>
    %184 = vector.multi_reduction <maximumf>, %183, %cst_56 [1] : vector<32x32xf32> to vector<32xf32>
    %185 = vector.shape_cast %184 : vector<32xf32> to vector<32x1xf32>
    %186 = vector.broadcast %185 : vector<32x1xf32> to vector<32x32xf32>
    %187 = arith.subf %183, %186 : vector<32x32xf32>
    %188 = math.exp %187 : vector<32x32xf32>
    %cst_57 = arith.constant dense<0.000000e+00> : vector<32xf32>
    %189 = vector.multi_reduction <add>, %188, %cst_57 [1] : vector<32x32xf32> to vector<32xf32>
    %190 = vector.shape_cast %189 : vector<32xf32> to vector<32x1xf32>
    %191 = tpu.reciprocal %190 {approx = true} : vector<32x1xf32> -> vector<32x1xf32>
    %cst_58 = arith.constant 2.500000e-01 : f32
    %192 = vector.broadcast %cst_58 : f32 to vector<32x1xf32>
    %193 = arith.mulf %191, %192 : vector<32x1xf32>
    %194 = vector.broadcast %193 : vector<32x1xf32> to vector<32x32xf32>
    %195 = arith.mulf %188, %194 : vector<32x32xf32>
    %196 = vector.extract_strided_slice %148 {offsets = [0, 2], sizes = [32, 1], strides = [1, 1]} : vector<32x8xf32> to vector<32x1xf32>
    %197 = vector.extract_strided_slice %149 {offsets = [6, 0], sizes = [1, 32], strides = [1, 1]} : vector<8x32xf32> to vector<1x32xf32>
    %198 = vector.broadcast %196 : vector<32x1xf32> to vector<32x32xf32>
    %199 = vector.broadcast %197 : vector<1x32xf32> to vector<32x32xf32>
    %200 = arith.addf %198, %199 : vector<32x32xf32>
    %cst_59 = arith.constant 0.000000e+00 : f32
    %201 = vector.broadcast %cst_59 : f32 to vector<32x32xf32>
    %202 = arith.cmpf ogt, %200, %201 : vector<32x32xf32>
    %cst_60 = arith.constant 2.000000e-01 : f32
    %203 = vector.broadcast %cst_60 : f32 to vector<32x32xf32>
    %204 = arith.mulf %203, %200 : vector<32x32xf32>
    %205 = arith.select %202, %200, %204 : vector<32x32xi1>, vector<32x32xf32>
    %206 = arith.addf %205, %1 : vector<32x32xf32>
    %cst_61 = arith.constant dense<0xFF800000> : vector<32xf32>
    %207 = vector.multi_reduction <maximumf>, %206, %cst_61 [1] : vector<32x32xf32> to vector<32xf32>
    %208 = vector.shape_cast %207 : vector<32xf32> to vector<32x1xf32>
    %209 = vector.broadcast %208 : vector<32x1xf32> to vector<32x32xf32>
    %210 = arith.subf %206, %209 : vector<32x32xf32>
    %211 = math.exp %210 : vector<32x32xf32>
    %cst_62 = arith.constant dense<0.000000e+00> : vector<32xf32>
    %212 = vector.multi_reduction <add>, %211, %cst_62 [1] : vector<32x32xf32> to vector<32xf32>
    %213 = vector.shape_cast %212 : vector<32xf32> to vector<32x1xf32>
    %214 = tpu.reciprocal %213 {approx = true} : vector<32x1xf32> -> vector<32x1xf32>
    %cst_63 = arith.constant 2.500000e-01 : f32
    %215 = vector.broadcast %cst_63 : f32 to vector<32x1xf32>
    %216 = arith.mulf %214, %215 : vector<32x1xf32>
    %217 = vector.broadcast %216 : vector<32x1xf32> to vector<32x32xf32>
    %218 = arith.mulf %211, %217 : vector<32x32xf32>
    %219 = vector.extract_strided_slice %148 {offsets = [0, 3], sizes = [32, 1], strides = [1, 1]} : vector<32x8xf32> to vector<32x1xf32>
    %220 = vector.extract_strided_slice %149 {offsets = [7, 0], sizes = [1, 32], strides = [1, 1]} : vector<8x32xf32> to vector<1x32xf32>
    %221 = vector.broadcast %219 : vector<32x1xf32> to vector<32x32xf32>
    %222 = vector.broadcast %220 : vector<1x32xf32> to vector<32x32xf32>
    %223 = arith.addf %221, %222 : vector<32x32xf32>
    %cst_64 = arith.constant 0.000000e+00 : f32
    %224 = vector.broadcast %cst_64 : f32 to vector<32x32xf32>
    %225 = arith.cmpf ogt, %223, %224 : vector<32x32xf32>
    %cst_65 = arith.constant 2.000000e-01 : f32
    %226 = vector.broadcast %cst_65 : f32 to vector<32x32xf32>
    %227 = arith.mulf %226, %223 : vector<32x32xf32>
    %228 = arith.select %225, %223, %227 : vector<32x32xi1>, vector<32x32xf32>
    %229 = arith.addf %228, %1 : vector<32x32xf32>
    %cst_66 = arith.constant dense<0xFF800000> : vector<32xf32>
    %230 = vector.multi_reduction <maximumf>, %229, %cst_66 [1] : vector<32x32xf32> to vector<32xf32>
    %231 = vector.shape_cast %230 : vector<32xf32> to vector<32x1xf32>
    %232 = vector.broadcast %231 : vector<32x1xf32> to vector<32x32xf32>
    %233 = arith.subf %229, %232 : vector<32x32xf32>
    %234 = math.exp %233 : vector<32x32xf32>
    %cst_67 = arith.constant dense<0.000000e+00> : vector<32xf32>
    %235 = vector.multi_reduction <add>, %234, %cst_67 [1] : vector<32x32xf32> to vector<32xf32>
    %236 = vector.shape_cast %235 : vector<32xf32> to vector<32x1xf32>
    %237 = tpu.reciprocal %236 {approx = true} : vector<32x1xf32> -> vector<32x1xf32>
    %cst_68 = arith.constant 2.500000e-01 : f32
    %238 = vector.broadcast %cst_68 : f32 to vector<32x1xf32>
    %239 = arith.mulf %237, %238 : vector<32x1xf32>
    %240 = vector.broadcast %239 : vector<32x1xf32> to vector<32x32xf32>
    %241 = arith.mulf %234, %240 : vector<32x32xf32>
    %242 = tpu.concatenate %172, %195, %218, %241 in 1 : vector<32x32xf32>, vector<32x32xf32>, vector<32x32xf32>, vector<32x32xf32> -> vector<32x128xf32>
    %243 = arith.truncf %242 : vector<32x128xf32> to vector<32x128xbf16>
    %244 = vector.extract_strided_slice %146 {offsets = [0, 0], sizes = [32, 32], strides = [1, 1]} : vector<32x128xbf16> to vector<32x32xbf16>
    %245 = vector.extract_strided_slice %146 {offsets = [0, 32], sizes = [32, 32], strides = [1, 1]} : vector<32x128xbf16> to vector<32x32xbf16>
    %246 = vector.extract_strided_slice %146 {offsets = [0, 64], sizes = [32, 32], strides = [1, 1]} : vector<32x128xbf16> to vector<32x32xbf16>
    %247 = vector.extract_strided_slice %146 {offsets = [0, 96], sizes = [32, 32], strides = [1, 1]} : vector<32x128xbf16> to vector<32x32xbf16>
    %248 = tpu.concatenate %244, %245, %246, %247 in 0 : vector<32x32xbf16>, vector<32x32xbf16>, vector<32x32xbf16>, vector<32x32xbf16> -> vector<128x32xbf16>
    %cst_69 = arith.constant dense<0.000000e+00> : vector<32x32xf32>
    %249 = tpu.matmul %243, %248, %cst_69 {dimension_numbers = #tpu.dot_dimension_numbers<[1], [0], [0], [1], [0, 0, 1, 1], [], []>} : vector<32x128xbf16>, vector<128x32xbf16>, vector<32x32xf32> -> vector<32x32xf32>
    %cst_70 = arith.constant dense<0.000000e+00> : vector<32xf32>
    %250 = vector.multi_reduction <add>, %249, %cst_70 [1] : vector<32x32xf32> to vector<32xf32>
    %251 = vector.shape_cast %250 : vector<32xf32> to vector<32x1xf32>
    %cst_71 = arith.constant 3.200000e+01 : f32
    %252 = vector.broadcast %cst_71 : f32 to vector<32x1xf32>
    %253 = arith.divf %251, %252 : vector<32x1xf32>
    %254 = vector.broadcast %253 : vector<32x1xf32> to vector<32x32xf32>
    %255 = arith.subf %249, %254 : vector<32x32xf32>
    %256 = arith.mulf %255, %255 : vector<32x32xf32>
    %cst_72 = arith.constant dense<0.000000e+00> : vector<32xf32>
    %257 = vector.multi_reduction <add>, %256, %cst_72 [1] : vector<32x32xf32> to vector<32xf32>
    %258 = vector.shape_cast %257 : vector<32xf32> to vector<32x1xf32>
    %cst_73 = arith.constant 3.200000e+01 : f32
    %259 = vector.broadcast %cst_73 : f32 to vector<32x1xf32>
    %260 = arith.divf %258, %259 : vector<32x1xf32>
    %261 = vector.broadcast %253 : vector<32x1xf32> to vector<32x32xf32>
    %262 = arith.subf %249, %261 : vector<32x32xf32>
    %cst_74 = arith.constant 9.99999974E-6 : f32
    %263 = vector.broadcast %cst_74 : f32 to vector<32x1xf32>
    %264 = arith.addf %260, %263 : vector<32x1xf32>
    %265 = math.rsqrt %264 : vector<32x1xf32>
    %266 = vector.broadcast %265 : vector<32x1xf32> to vector<32x32xf32>
    %267 = arith.mulf %262, %266 : vector<32x32xf32>
    %c0_75 = arith.constant 0 : index
    %c0_76 = arith.constant 0 : index
    %268 = vector.load %arg11[%c0_75, %c0_76] : memref<1x32xf32, #tpu.memory_space<vmem>>, vector<1x32xf32>
    %269 = vector.broadcast %268 : vector<1x32xf32> to vector<32x32xf32>
    %270 = arith.mulf %267, %269 : vector<32x32xf32>
    %c0_77 = arith.constant 0 : index
    %c0_78 = arith.constant 0 : index
    %271 = vector.load %arg12[%c0_77, %c0_78] : memref<1x32xf32, #tpu.memory_space<vmem>>, vector<1x32xf32>
    %272 = vector.broadcast %271 : vector<1x32xf32> to vector<32x32xf32>
    %273 = arith.addf %270, %272 : vector<32x32xf32>
    %cst_79 = arith.constant 0.000000e+00 : f32
    %274 = vector.broadcast %cst_79 : f32 to vector<32x32xf32>
    %275 = arith.maximumf %273, %274 : vector<32x32xf32>
    %276 = tpu.concatenate %142, %275 in 1 : vector<32x32xf32>, vector<32x32xf32> -> vector<32x64xf32>
    %cst_80 = arith.constant dense<0.000000e+00> : vector<64xf32>
    %277 = vector.multi_reduction <add>, %276, %cst_80 [0] : vector<32x64xf32> to vector<64xf32>
    %278 = vector.shape_cast %277 : vector<64xf32> to vector<1x64xf32>
    %cst_81 = arith.constant 3.125000e-02 : f32
    %279 = vector.broadcast %cst_81 : f32 to vector<1x64xf32>
    %280 = arith.mulf %278, %279 : vector<1x64xf32>
    %c0_82 = arith.constant 0 : index
    %c0_83 = arith.constant 0 : index
    %281 = vector.load %arg13[%c0_82, %c0_83] : memref<64x32xf32, #tpu.memory_space<vmem>>, vector<64x32xf32>
    %cst_84 = arith.constant dense<0.000000e+00> : vector<1x32xf32>
    %282 = tpu.matmul %280, %281, %cst_84 {dimension_numbers = #tpu.dot_dimension_numbers<[1], [0], [0], [1], [0, 0, 1, 1], [], []>} : vector<1x64xf32>, vector<64x32xf32>, vector<1x32xf32> -> vector<1x32xf32>
    %c0_85 = arith.constant 0 : index
    %c0_86 = arith.constant 0 : index
    %283 = vector.load %arg14[%c0_85, %c0_86] : memref<1x32xf32, #tpu.memory_space<vmem>>, vector<1x32xf32>
    %284 = arith.addf %282, %283 : vector<1x32xf32>
    %cst_87 = arith.constant 0.000000e+00 : f32
    %285 = vector.broadcast %cst_87 : f32 to vector<1x32xf32>
    %286 = arith.maximumf %284, %285 : vector<1x32xf32>
    %c0_88 = arith.constant 0 : index
    %c0_89 = arith.constant 0 : index
    %287 = vector.load %arg15[%c0_88, %c0_89] : memref<32x4xf32, #tpu.memory_space<vmem>>, vector<32x4xf32>
    %cst_90 = arith.constant dense<0.000000e+00> : vector<1x4xf32>
    %288 = tpu.matmul %286, %287, %cst_90 {dimension_numbers = #tpu.dot_dimension_numbers<[1], [0], [0], [1], [0, 0, 1, 1], [], []>} : vector<1x32xf32>, vector<32x4xf32>, vector<1x4xf32> -> vector<1x4xf32>
    %c0_91 = arith.constant 0 : index
    %c0_92 = arith.constant 0 : index
    %289 = vector.load %arg16[%c0_91, %c0_92] : memref<1x4xf32, #tpu.memory_space<vmem>>, vector<1x4xf32>
    %290 = arith.addf %288, %289 : vector<1x4xf32>
    %c0_93 = arith.constant 0 : index
    %c0_94 = arith.constant 0 : index
    %291 = vector.load %arg17[%c0_93, %c0_94] : memref<1x4xf32, #tpu.memory_space<vmem>>, vector<1x4xf32>
    tpu.vector_store %arg17[%c0_93, %c0_94], %290 {strides = array<i32>} : memref<1x4xf32, #tpu.memory_space<vmem>>, vector<1x4xf32>,
    return
  }
  func.func @transform_0(%arg0: i32) -> (i32, i32) {
    %c0_i32 = arith.constant 0 : i32
    %c0_i32_0 = arith.constant 0 : i32
    %c0_i32_1 = arith.constant 0 : i32
    return %c0_i32, %c0_i32_0 : i32, i32
  }
  func.func @transform_1(%arg0: i32) -> (i32, i32) {
    %c0_i32 = arith.constant 0 : i32
    %c0_i32_0 = arith.constant 0 : i32
    %c0_i32_1 = arith.constant 0 : i32
    return %c0_i32, %c0_i32_0 : i32, i32
  }
  func.func @transform_2(%arg0: i32) -> (i32, i32) {
    %c0_i32 = arith.constant 0 : i32
    %c0_i32_0 = arith.constant 0 : i32
    %c0_i32_1 = arith.constant 0 : i32
    return %c0_i32, %c0_i32_0 : i32, i32
  }
  func.func @transform_3(%arg0: i32) -> (i32, i32) {
    %c0_i32 = arith.constant 0 : i32
    %c0_i32_0 = arith.constant 0 : i32
    %c0_i32_1 = arith.constant 0 : i32
    return %c0_i32, %c0_i32_0 : i32, i32
  }
  func.func @transform_4(%arg0: i32) -> (i32, i32) {
    %c0_i32 = arith.constant 0 : i32
    %c0_i32_0 = arith.constant 0 : i32
    %c0_i32_1 = arith.constant 0 : i32
    return %c0_i32, %c0_i32_0 : i32, i32
  }
  func.func @transform_5(%arg0: i32) -> (i32, i32) {
    %c0_i32 = arith.constant 0 : i32
    %c0_i32_0 = arith.constant 0 : i32
    %c0_i32_1 = arith.constant 0 : i32
    return %c0_i32, %c0_i32_0 : i32, i32
  }
  func.func @transform_6(%arg0: i32) -> (i32, i32) {
    %c0_i32 = arith.constant 0 : i32
    %c0_i32_0 = arith.constant 0 : i32
    %c0_i32_1 = arith.constant 0 : i32
    return %c0_i32, %c0_i32_0 : i32, i32
  }
  func.func @transform_7(%arg0: i32) -> (i32, i32) {
    %c0_i32 = arith.constant 0 : i32
    %c0_i32_0 = arith.constant 0 : i32
    %c0_i32_1 = arith.constant 0 : i32
    return %c0_i32, %c0_i32_0 : i32, i32
  }
  func.func @transform_8(%arg0: i32) -> (i32, i32) {
    %c0_i32 = arith.constant 0 : i32
    %c0_i32_0 = arith.constant 0 : i32
    %c0_i32_1 = arith.constant 0 : i32
    return %c0_i32, %c0_i32_0 : i32, i32
  }
  func.func @transform_9(%arg0: i32) -> (i32, i32) {
    %c0_i32 = arith.constant 0 : i32
    %c0_i32_0 = arith.constant 0 : i32
    %c0_i32_1 = arith.constant 0 : i32
    return %c0_i32, %c0_i32_0 : i32, i32
  }
  func.func @transform_10(%arg0: i32) -> (i32, i32) {
    %c0_i32 = arith.constant 0 : i32
    %c0_i32_0 = arith.constant 0 : i32
    %c0_i32_1 = arith.constant 0 : i32
    return %c0_i32, %c0_i32_0 : i32, i32
  }
  func.func @transform_11(%arg0: i32) -> (i32, i32) {
    %c0_i32 = arith.constant 0 : i32
    %c0_i32_0 = arith.constant 0 : i32
    %c0_i32_1 = arith.constant 0 : i32
    return %c0_i32, %c0_i32_0 : i32, i32
  }
  func.func @transform_12(%arg0: i32) -> (i32, i32) {
    %c0_i32 = arith.constant 0 : i32
    %c0_i32_0 = arith.constant 0 : i32
    %c0_i32_1 = arith.constant 0 : i32
    return %c0_i32, %c0_i32_0 : i32, i32
  }
  func.func @transform_13(%arg0: i32) -> (i32, i32) {
    %c0_i32 = arith.constant 0 : i32
    %c0_i32_0 = arith.constant 0 : i32
    %c0_i32_1 = arith.constant 0 : i32
    return %c0_i32, %c0_i32_0 : i32, i32
  }
  func.func @transform_14(%arg0: i32) -> (i32, i32) {
    %c0_i32 = arith.constant 0 : i32
    %c0_i32_0 = arith.constant 0 : i32
    %c0_i32_1 = arith.constant 0 : i32
    return %c0_i32, %c0_i32_0 : i32, i32
  }
  func.func @transform_15(%arg0: i32) -> (i32, i32) {
    %c0_i32 = arith.constant 0 : i32
    %c0_i32_0 = arith.constant 0 : i32
    %c0_i32_1 = arith.constant 0 : i32
    return %c0_i32, %c0_i32_0 : i32, i32
  }
  func.func @transform_16(%arg0: i32) -> (i32, i32) {
    %c0_i32 = arith.constant 0 : i32
    %c0_i32_0 = arith.constant 0 : i32
    %c0_i32_1 = arith.constant 0 : i32
    return %c0_i32, %c0_i32_0 : i32, i32
  }
}

</mosaic_0001>

<bundles_post_ra>
// kernel: tpu_custom_call.1
= control target key start
LH: loop header
LB: loop body
LE: loop exit
PB: predicated region body
PF: predicated region fallthrough
CT: control target
= control target key end

     0   :  { %s3323_s0 = inlined_call_operand.vmem [shape: f32[32,1], index: 0, kind: input, shape index: {}]   ;;  %s3324_s1 = inlined_call_operand.vmem [shape: f32[1,16], index: 1, kind: input, shape index: {}]   ;;  %s3325_s2 = inlined_call_operand.vmem [shape: f32[1,16], index: 2, kind: input, shape index: {}]   ;;  %s3326_s3 = inlined_call_operand.vmem [shape: bf16[32,32], index: 3, kind: input, shape index: {}]   ;;  %s3327_s4 = inlined_call_operand.vmem [shape: bf16[16,128], index: 4, kind: input, shape index: {}]   ;;  %s3328_s5 = inlined_call_operand.vmem [shape: bf16[128,8], index: 5, kind: input, shape index: {}]   ;;  %s3329_s6 = inlined_call_operand.vmem [shape: f32[1,32], index: 6, kind: input, shape index: {}]   ;;  %s3330_s7 = inlined_call_operand.vmem [shape: f32[1,32], index: 7, kind: input, shape index: {}]   ;;  %s3331_s8 = inlined_call_operand.vmem [shape: bf16[32,128], index: 8, kind: input, shape index: {}]   ;;  %s3332_s9 = inlined_call_operand.vmem [shape: bf16[128,8], index: 9, kind: input, shape index: {}]   ;;  %s3333_s10 = inlined_call_operand.vmem [shape: f32[1,32], index: 10, kind: input, shape index: {}]   ;;  %s3334_s11 = inlined_call_operand.vmem [shape: f32[1,32], index: 11, kind: input, shape index: {}]   ;;  %s3335_s12 = inlined_call_operand.vmem [shape: f32[64,32], index: 12, kind: input, shape index: {}]   ;;  %s3336_s13 = inlined_call_operand.vmem [shape: f32[1,32], index: 13, kind: input, shape index: {}]   ;;  %s3337_s14 = inlined_call_operand.vmem [shape: f32[32,4], index: 14, kind: input, shape index: {}]   ;;  %s3338_s15 = inlined_call_operand.vmem [shape: f32[1,4], index: 15, kind: input, shape index: {}]   ;;  %s3339_s16 = inlined_call_operand.hbm [shape: f32[1,4], index: 16, kind: output, shape index: {}]  }
   0x1   :  { %3341 = sst [smem:[#allocation5_spill]] %s3323_s0 }
   0x2   :  { %s3342_s23 = sld [smem:[#allocation5_spill]]  ;;  %v2419_v2 = vmov 0   ;;  %v2232_v5 = vld [vmem:[%s3327_s4] sm:$0xff]   ;;  %v2234_v7 = vld [vmem:[%s3328_s5 + $0x8] sm:$0xff]   ;;  %v2235_v8 = vld [vmem:[%s3328_s5 + $0x10] sm:$0xff]  }
   0x3   :  { %2142 = vset.pattern.permute.xlu1 %v2419_v2  ;;  %2141 = vset.pattern.permute.xlu0 %v2419_v2  ;;  %v2233_v6 = vld [vmem:[%s3328_s5] sm:$0xff]  }
   0x4   :  { %1988 = vmatprep.subr.bf16.mxu0 %v2232_v5  ;;  %1994 = vmatprep.subr.bf16.mxu1 %v2233_v6 }
   0x5   :  { %1989 = vmatpush3.bf16.msra.mxu0 %v2232_v5  ;;  %1995 = vmatpush3.bf16.msra.mxu1 %v2233_v6 }
   0x6   :  { %1996 = vmatprep.subr.bf16.mxu1 %v2234_v7 }
   0x8   :  { %v65_v0 = vld [vmem:[%s3342_s23 + $0x10] sm:$0xff]  ;;  %v63_v1 = vld [vmem:[%s3342_s23] sm:$0xff]  ;;  %v66_v3 = vld [vmem:[%s3342_s23 + $0x18] sm:$0xff] }
   0x9   :  { %v64_v4 = vld [vmem:[%s3342_s23 + $0x8] sm:$0xff]  ;;  %80 = vperm.xlu1 %2142, %v65_v0   ;;  %70 = vperm.xlu0 %2141, %v63_v1  }
   0xd   :  { %85 = vperm.xlu1 %2142, %v66_v3   ;;  %75 = vperm.xlu0 %2141, %v64_v4  }
   0xe   :  { %21 = vsyncpa [#allocation3], 0  ;;  %1997 = vmatpush3.bf16.msra.mxu1 %v2234_v7  ;;  %v2236_v9 = vld [vmem:[%s3328_s5 + $0x18] sm:$0xff]   ;;  %v2237_v10 = vld [vmem:[%s3328_s5 + $0x20] sm:$0xff]   ;;  %vm119_vm0 = vcmask 130048   ;;  %v2420_v30 = vmov 1   ;;  %v342_v49 = vlaneseq }
   0xf   :  { %1998 = vmatprep.subr.bf16.mxu1 %v2235_v8  ;;  %v2238_v11 = vld [vmem:[%s3328_s5 + $0x28] sm:$0xff]   ;;  %v2239_v12 = vld [vmem:[%s3328_s5 + $0x30] sm:$0xff]   ;;  %v1887_v13 = vld [vmem:[%s3324_s1] ss:$0 sm:$0xff]  ;;  %v2421_v41 = vmov 2   ;;  %v2422_v42 = vmov 3  }
  0x10   :  { %v1888_v18 = vld [vmem:[%s3325_s2] ss:$0 sm:$0xff]  ;;  %v2240_v29 = vld [vmem:[%s3328_s5 + $0x38] sm:$0xff]   ;;  %v2590_v52 = vshrl.u32 %v342_v49, 7  ;;  %v2603_v59 = vld [vmem:[%s3326_s3 + $0x8] sm:$0xff]   ;;  %vm366_vm1 = vcmask 261120  }
  0x11   :  { %2143 = vset.pattern.permute.xlu1 %v2420_v30  ;;  %v1919_v1 = vld [vmem:[%s3326_s3] sm:$0xff]   ;;  %v2625_v4 = vunpack.c.l.bf16 %v2603_v59  ;;  %s2423_s3 = smov 96   ;;  %s2424_s22 = smov 64  }
  0x12   :  { %1999 = vmatpush3.bf16.msra.mxu1 %v2235_v8  ;;  %v344_v55 = vsub.s32 4, %v2590_v52  ;;  %v433_v56 = vsub.s32 5, %v2590_v52  ;;  %v521_v57 = vsub.s32 6, %v2590_v52  ;;  %v609_v58 = vsub.s32 7, %v2590_v52  ;;  %s2425_s4 = smov 32  }
  0x13   :  { %2000 = vmatprep.subr.bf16.mxu1 %v2236_v9 }
  0x16   :  { %2001 = vmatpush3.bf16.msra.mxu1 %v2236_v9  ;;  %v2631_v9 = vunpack.c.l.bf16 %v1919_v1 }
  0x17   :  { %2002 = vmatprep.subr.bf16.mxu1 %v2237_v10 }
  0x1a   :  { %2003 = vmatpush3.bf16.msra.mxu1 %v2237_v10 }
  0x1b   :  { %2004 = vmatprep.subr.bf16.mxu1 %v2238_v11 }
  0x1e   :  { %2005 = vmatpush3.bf16.msra.mxu1 %v2238_v11 }
  0x1f   :  { %2006 = vmatprep.subr.bf16.mxu1 %v2239_v12 }
  0x22   :  { %2007 = vmatpush3.bf16.msra.mxu1 %v2239_v12 }
  0x23   :  { %2008 = vmatprep.subr.bf16.mxu1 %v2240_v29 }
  0x26   :  { %2009 = vmatpush3.bf16.msra.mxu1 %v2240_v29 }
  0x88   :  { %v81_v14 = vpop.permute.xlu1 %80  ;;  %v71_v15 = vpop.permute.xlu0 %70 }
  0x89   :  { %v96_v16 = vmul.f32 %v1887_v13, %v81_v14  ;;  %v94_v17 = vmul.f32 %v1887_v13, %v71_v15 }
  0x8b   :  { %v107_v23 = vadd.f32 %v1888_v18, %v96_v16  ;;  %v105_v25 = vadd.f32 %v1888_v18, %v94_v17 }
  0x8c   :  { %v86_v19 = vpop.permute.xlu1 %85  ;;  %v76_v20 = vpop.permute.xlu0 %75 }
  0x8d   :  { %v97_v21 = vmul.f32 %v1887_v13, %v86_v19  ;;  %v95_v22 = vmul.f32 %v1887_v13, %v76_v20 }
  0x8f   :  { %v108_v24 = vadd.f32 %v1888_v18, %v97_v21  ;;  %v106_v26 = vadd.f32 %v1888_v18, %v95_v22 }
  0x91   :  { %v110_v27 = vpack.c.bf16 %v108_v24, %v107_v23  ;;  %v109_v28 = vpack.c.bf16 %v106_v26, %v105_v25  ;;  %v2645_v25 = vunpack.c.h.bf16 %v1919_v1 }
  0x93   :  { %1990 = vmatprep.mubr.msk.bf16.mxu0 %vm119_vm0, %v109_v28 }
  0x94   :  { %1991 = vmatmul.mubr.msk.bf16.vlgmr.msra.gmra.mrb[0].mxu0 %vm119_vm0, %v110_v27 }
 0x167   :  { %v1992_v31 = vpop.f32.mrb[0].mxu0 }
 0x168   :  { %v160_v32 = vpop.f32.mrb[1].mxu0 }
 0x169   :  { %v1993_v33 = vpop.f32.mrb[2].mxu0 }
 0x16a   :  { %v2563_v34 = vpack.c.bf16 %v1993_v33, %v1992_v31  ;;  %v163_v35 = vpop.f32.mrb[3].mxu0 }
 0x16b   :  { %v2565_v36 = vpack.c.bf16 %v163_v35, %v160_v32 }
 0x16d   :  { %2010 = vmatprep.mubr.bf16.mxu1 %v2565_v36  ;;  %2014 = vmatprep.subr.bf16.mxu0 %v2565_v36 }
 0x16e   :  { %2011 = vmatmul.mubr.bf16.vlgmr.msra.gmra.mrb[0].mxu1 %v2563_v34  ;;  %2015 = vmatpush3.bf16.msra.mxu0 %v2565_v36 }
 0x16f   :  { %2016 = vmatprep.subr.bf16.mxu0 %v2563_v34 }
 0x172   :  { %2017 = vmatpush3.bf16.msra.mxu0 %v2563_v34 }
 0x241   :  { %v2012_v37 = vpop.f32.mrb[0].mxu1 }
 0x242   :  { %334 = vperm.xlu0 %2141, %v2012_v37   ;;  %424 = vperm.xlu1 %2143, %v2012_v37   ;;  %v275_v38 = vpop.f32.mrb[1].mxu1 }
 0x243   :  { %v2013_v39 = vpop.f32.mrb[2].mxu1 }
 0x244   :  { %v278_v40 = vpop.f32.mrb[3].mxu1 }
 0x246   :  { %2146 = vset.pattern.permute.xlu0 %v2420_v30  ;;  %2144 = vset.pattern.permute.xlu1 %v2421_v41 }
 0x247   :  { %512 = vperm.xlu1 %2144, %v2012_v37   ;;  %416 = vperm.xlu0 %2146, %v275_v38  }
 0x24b   :  { %2145 = vset.pattern.permute.xlu1 %v2422_v42  ;;  %2148 = vset.pattern.permute.xlu0 %v2422_v42 }
 0x24c   :  { %600 = vperm.xlu1 %2145, %v2012_v37   ;;  %592 = vperm.xlu0 %2148, %v275_v38  }
 0x250   :  { %2147 = vset.pattern.permute.xlu1 %v2421_v41  ;;  %2149 = vset.pattern.permute.xlu0 %v2419_v2 }
 0x251   :  { %504 = vperm.xlu1 %2147, %v275_v38   ;;  %324 = vperm.xlu0 %2149, %v275_v38  }
 0x255   :  { %2150 = vset.pattern.permute.xlu0 %v2420_v30  ;;  %516 = vperm.xlu1 %2147, %v2013_v39  }
 0x256   :  { %428 = vperm.xlu0 %2150, %v2013_v39  }
 0x259   :  { %2153 = vset.pattern.permute.xlu1 %v2420_v30 }
 0x25a   :  { %2151 = vset.pattern.permute.xlu0 %v2422_v42  ;;  %420 = vperm.xlu1 %2153, %v278_v40  }
 0x25b   :  { %604 = vperm.xlu0 %2151, %v2013_v39  }
 0x25e   :  { %2155 = vset.pattern.permute.xlu1 %v2422_v42 }
 0x25f   :  { %2152 = vset.pattern.permute.xlu0 %v2419_v2  ;;  %596 = vperm.xlu1 %2155, %v278_v40  }
 0x260   :  { %339 = vperm.xlu0 %2152, %v2013_v39  }
 0x264   :  { %2154 = vset.pattern.permute.xlu0 %v2421_v41 }
 0x265   :  { %508 = vperm.xlu0 %2154, %v278_v40  }
 0x269   :  { %2156 = vset.pattern.permute.xlu0 %v2419_v2 }
 0x26a   :  { %329 = vperm.xlu0 %2156, %v278_v40  }
 0x26e   :  { %2189 = vset.pattern.permute.xlu0 %v2422_v42 }
 0x288   :  { %290 = vxpose.xlu1.b32.start [1/4] (short) (narrow) %v275_v38, 8 }
 0x28c   :  { %291 = vxpose.xlu1.b32.cont [2/4] (short) (narrow) %v278_v40, 8 }
 0x290   :  { %292 = vxpose.xlu1.b32.cont [3/4] (short) (narrow) %v2012_v37, 8 }
 0x294   :  { %293 = vxpose.xlu1.b32.end [4/4] (short) (narrow) %v2013_v39, 8 }
 0x2b2   :  { %2187 = vset.pattern.permute.xlu1 %v2420_v30 }
 0x2c1   :  { %v425_v43 = vpop.permute.xlu1 %424  ;;  %v335_v47 = vpop.permute.xlu0 %334 }
 0x2c6   :  { %v513_v44 = vpop.permute.xlu1 %512  ;;  %v417_v50 = vpop.permute.xlu0 %416 }
 0x2cb   :  { %v601_v45 = vpop.permute.xlu1 %600  ;;  %v2592_v53 = vpop.permute.xlu0 %592 }
 0x2d0   :  { %v505_v46 = vpop.permute.xlu1 %504  ;;  %v325_v3 = vpop.permute.xlu0 %324 }
 0x2d4   :  { %v2588_v48 = vpop.permute.xlu1 %516 }
 0x2d5   :  { %v429_v35 = vpop.permute.xlu0 %428 }
 0x2d9   :  { %v421_v51 = vpop.permute.xlu1 %420 }
 0x2de   :  { %v2594_v54 = vpop.permute.xlu1 %596 }
 0x308   :  { %v306_v60 = vpop.trf.xlu1 }
 0x309   :  { %v2607_v61 = vrot.slane %v306_v60, %v344_v55  ;;  %v2611_v62 = vrot.slane %v306_v60, %v433_v56  ;;  %v2615_v63 = vrot.slane %v306_v60, %v521_v57  ;;  %v2619_v0 = vrot.slane %v306_v60, %v609_v58 }
 0x30b   :  { %v437_v5 = vadd.f32 %v2611_v62, %v425_v43  ;;  %v348_v6 = vadd.f32 %v2607_v61, %v335_v47  ;;  %v525_v7 = vadd.f32 %v2615_v63, %v513_v44  ;;  %v346_v8 = vadd.f32 %v2607_v61, %v325_v3  ;;  %v605_v47 = vpop.permute.xlu0 %604 }
 0x30c   :  { %v613_v10 = vadd.f32 %v2619_v0, %v601_v45  ;;  %v436_v11 = vadd.f32 %v2611_v62, %v421_v51  ;;  %v435_v12 = vadd.f32 %v2611_v62, %v417_v50  ;;  %v523_v33 = vadd.f32 %v2615_v63, %v505_v46 }
 0x30d   :  { %vm441_vm2 = vcmp.gt.f32.partialorder %v437_v5, 0.0  ;;  %v445_v13 = vmul.f32 0.2, %v437_v5  ;;  %vm352_vm3 = vcmp.gt.f32.partialorder %v348_v6, 0.0  ;;  %v356_v14 = vmul.f32 0.2, %v348_v6 }
 0x30e   :  { %vm529_vm4 = vcmp.gt.f32.partialorder %v525_v7, 0.0  ;;  %v533_v15 = vmul.f32 0.2, %v525_v7  ;;  %vm350_vm5 = vcmp.gt.f32.partialorder %v346_v8, 0.0  ;;  %v354_v16 = vmul.f32 0.2, %v346_v8 }
 0x30f   :  { %v449_v17 = vsel %vm441_vm2, %v437_v5, %v445_v13  ;;  %v360_v18 = vsel %vm352_vm3, %v348_v6, %v356_v14  ;;  %vm617_vm6 = vcmp.gt.f32.partialorder %v613_v10, 0.0  ;;  %v621_v19 = vmul.f32 0.2, %v613_v10 }
 0x310   :  { %v2637_v20 = vadd.f32 %v2625_v4, %v449_v17  ;;  %v2640_v21 = vadd.f32 %v2625_v4, %v360_v18  ;;  %v537_v22 = vsel %vm529_vm4, %v525_v7, %v533_v15  ;;  %v358_v23 = vsel %vm350_vm5, %v346_v8, %v354_v16 }
 0x311   :  { %v2643_v24 = vadd.f32 %v2625_v4, %v537_v22  ;;  %vm440_vm7 = vcmp.gt.f32.partialorder %v436_v11, 0.0  ;;  %v2652_v28 = vadd.f32 %v2631_v9, %v358_v23  ;;  %v444_v29 = vmul.f32 0.2, %v436_v11 }
 0x312   :  { %v461_v26 = vsel %vm366_vm1, %v2637_v20, -inf  ;;  %v373_v27 = vsel %vm366_vm1, %v2640_v21, -inf  ;;  %v625_v31 = vsel %vm617_vm6, %v613_v10, %v621_v19  ;;  %v443_v32 = vmul.f32 0.2, %v435_v12  ;;  %v340_v10 = vpop.permute.xlu0 %339 }
 0x313   :  { %462 = vmax.xlane.f32.xlu0 %v461_v26  ;;  %374 = vmax.xlane.f32.xlu1 %v373_v27  ;;  %v448_v37 = vsel %vm440_vm7, %v436_v11, %v444_v29  ;;  %vm439_vm8 = vcmp.gt.f32.partialorder %v435_v12, 0.0  ;;  %v549_v38 = vsel %vm366_vm1, %v2643_v24, -inf  ;;  %v367_v39 = vsel %vm366_vm1, %v2652_v28, -inf }
 0x314   :  { %v2660_v40 = vadd.f32 %v2625_v4, %v625_v31  ;;  %v2663_v43 = vadd.f32 %v2645_v25, %v448_v37  ;;  %v447_v44 = vsel %vm439_vm8, %v435_v12, %v443_v32  ;;  %v531_v45 = vmul.f32 0.2, %v523_v33 }
 0x315   :  { %v611_v46 = vadd.f32 %v2619_v0, %v2592_v53  ;;  %vm527_vm9 = vcmp.gt.f32.partialorder %v523_v33, 0.0  ;;  %v2672_v51 = vadd.f32 %v2631_v9, %v447_v44  ;;  %v438_v3 = vadd.f32 %v2611_v62, %v429_v35 }
 0x316   :  { %v637_v49 = vsel %vm366_vm1, %v2660_v40, -inf  ;;  %v458_v50 = vsel %vm366_vm1, %v2663_v43, -inf  ;;  %v535_v60 = vsel %vm527_vm9, %v523_v33, %v531_v45  ;;  %v526_v8 = vadd.f32 %v2615_v63, %v2588_v48  ;;  %v509_v16 = vpop.permute.xlu0 %508 }
 0x317   :  { %550 = vmax.xlane.f32.xlu0 %v549_v38  ;;  %368 = vmax.xlane.f32.xlu1 %v367_v39  ;;  %v619_v1 = vmul.f32 0.2, %v611_v46  ;;  %vm615_vm10 = vcmp.gt.f32.partialorder %v611_v46, 0.0  ;;  %v455_v53 = vsel %vm366_vm1, %v2672_v51, -inf  ;;  %v2678_v5 = vadd.f32 %v2631_v9, %v535_v60 }
 0x318   :  { %v446_v7 = vmul.f32 0.2, %v438_v3  ;;  %vm442_vm11 = vcmp.gt.f32.partialorder %v438_v3, 0.0  ;;  %v2688_v12 = vunpack.c.h.bf16 %v2603_v59  ;;  %v534_v14 = vmul.f32 0.2, %v526_v8 }
 0x319   :  { %v623_v6 = vsel %vm615_vm10, %v611_v46, %v619_v1  ;;  %v543_v11 = vsel %vm366_vm1, %v2678_v5, -inf  ;;  %v614_v15 = vadd.f32 %v2619_v0, %v605_v47  ;;  %vm530_vm12 = vcmp.gt.f32.partialorder %v526_v8, 0.0 }
 0x31a   :  { %v2685_v62 = vadd.f32 %v2631_v9, %v623_v6  ;;  %v450_v13 = vsel %vm442_vm11, %v438_v3, %v446_v7  ;;  %v538_v18 = vsel %vm530_vm12, %v526_v8, %v534_v14  ;;  %v524_v22 = vadd.f32 %v2615_v63, %v509_v16 }
 0x31b   :  { %638 = vmax.xlane.f32.xlu0 %v637_v49  ;;  %459 = vmax.xlane.f32.xlu1 %v458_v50  ;;  %v2694_v17 = vadd.f32 %v2688_v12, %v450_v13  ;;  %v622_v19 = vmul.f32 0.2, %v614_v15  ;;  %vm618_vm13 = vcmp.gt.f32.partialorder %v614_v15, 0.0  ;;  %v2700_v23 = vadd.f32 %v2688_v12, %v538_v18  ;;  %v330_v50 = vpop.permute.xlu0 %329 }
 0x31c   :  { %v631_v48 = vsel %vm366_vm1, %v2685_v62, -inf  ;;  %v532_v27 = vmul.f32 0.2, %v524_v22  ;;  %v612_v29 = vadd.f32 %v2619_v0, %v2594_v54  ;;  %vm528_vm14 = vcmp.gt.f32.partialorder %v524_v22, 0.0 }
 0x31d   :  { %v464_v59 = vsel %vm366_vm1, %v2694_v17, -inf  ;;  %v626_v26 = vsel %vm618_vm13, %v614_v15, %v622_v19  ;;  %v552_v63 = vsel %vm366_vm1, %v2700_v23, -inf  ;;  %v349_v35 = vadd.f32 %v2607_v61, %v340_v10 }
 0x31e   :  { %v2709_v31 = vadd.f32 %v2688_v12, %v626_v26  ;;  %v536_v32 = vsel %vm528_vm14, %v524_v22, %v532_v27  ;;  %v620_v33 = vmul.f32 0.2, %v612_v29  ;;  %vm616_vm15 = vcmp.gt.f32.partialorder %v612_v29, 0.0 }
 0x31f   :  { %456 = vmax.xlane.f32.xlu0 %v455_v53  ;;  %v2717_v0 = vadd.f32 %v2645_v25, %v536_v32  ;;  %v357_v38 = vmul.f32 0.2, %v349_v35  ;;  %vm353_vm0 = vcmp.gt.f32.partialorder %v349_v35, 0.0  ;;  %v347_v60 = vadd.f32 %v2607_v61, %v330_v50 }
 0x320   :  { %v640_v54 = vsel %vm366_vm1, %v2709_v31, -inf  ;;  %v624_v37 = vsel %vm616_vm15, %v612_v29, %v620_v33  ;;  %vm731_vm3 = vcmask 523264   ;;  %vm736_vm4 = vcmask 785408  }
 0x321   :  { %v546_v39 = vsel %vm366_vm1, %v2717_v0, -inf  ;;  %v2722_v44 = vadd.f32 %v2645_v25, %v624_v37  ;;  %v361_v45 = vsel %vm353_vm0, %v349_v35, %v357_v38  ;;  %v355_v1 = vmul.f32 0.2, %v347_v60 }
 0x322   :  { %v2727_v47 = vadd.f32 %v2688_v12, %v361_v45  ;;  %vm351_vm2 = vcmp.gt.f32.partialorder %v347_v60, 0.0 }
 0x323   :  { %544 = vmax.xlane.f32.xlu0 %v543_v11  ;;  %v634_v46 = vsel %vm366_vm1, %v2722_v44, -inf  ;;  %v359_v3 = vsel %vm351_vm2, %v347_v60, %v355_v1 }
 0x324   :  { %v376_v49 = vsel %vm366_vm1, %v2727_v47, -inf  ;;  %v2735_v53 = vadd.f32 %v2645_v25, %v359_v3 }
 0x326   :  { %v370_v6 = vsel %vm366_vm1, %v2735_v53, -inf }
 0x327   :  { %632 = vmax.xlane.f32.xlu0 %v631_v48 }
 0x32b   :  { %465 = vmax.xlane.f32.xlu0 %v464_v59 }
 0x32c   :  { %745 = vrot.lane.b32.xlu1 %v2565_v36, %s2423_s3 }
 0x32f   :  { %553 = vmax.xlane.f32.xlu0 %v552_v63 }
 0x330   :  { %751 = vrot.lane.b32.xlu1 %v2565_v36, %s2424_s22 }
 0x333   :  { %641 = vmax.xlane.f32.xlu0 %v640_v54 }
 0x337   :  { %547 = vmax.xlane.f32.xlu0 %v546_v39 }
 0x33b   :  { %635 = vmax.xlane.f32.xlu0 %v634_v46 }
 0x33f   :  { %377 = vmax.xlane.f32.xlu0 %v376_v49 }
 0x355   :  { %747 = vrot.lane.b32.xlu0 %v2563_v34, %s2423_s3 }
 0x374   :  { %371 = vmax.xlane.f32.xlu0 %v370_v6 }
 0x3a0   :  { %v463_v7 = vpop.xlane.xlu0 %462  ;;  %v375_v8 = vpop.xlane.xlu1 %374 }
 0x3a1   :  { %v469_v10 = vsub.f32 %v2637_v20, %v463_v7  ;;  %v381_v15 = vsub.f32 %v2640_v21, %v375_v8 }
 0x3a3   :  { %v475_v11 = vmul.f32 1.442695, %v469_v10  ;;  %v387_v22 = vmul.f32 1.442695, %v381_v15 }
 0x3a4   :  { %v551_v13 = vpop.xlane.xlu0 %550  ;;  %v2740_v14 = vpop.xlane.xlu1 %368 }
 0x3a5   :  { %2251 = vpow2.f32 %v475_v11  ;;  %v557_v61 = vsub.f32 %v2643_v24, %v551_v13 }
 0x3a7   :  { %v563_v16 = vmul.f32 1.442695, %v557_v61 }
 0x3a8   :  { %v639_v48 = vpop.xlane.xlu0 %638  ;;  %v2744_v18 = vpop.xlane.xlu1 %459 }
 0x3a9   :  { %2253 = vpow2.f32 %v563_v16  ;;  %v645_v19 = vsub.f32 %v2660_v40, %v639_v48 }
 0x3ab   :  { %v651_v59 = vmul.f32 1.442695, %v645_v19  ;;  %v468_v19 = vsub.f32 %v2663_v43, %v2744_v18 }
 0x3ac   :  { %v457_v26 = vpop.xlane.xlu0 %456  ;;  %v746_v20 = vpop.permute.xlu1 %745 }
 0x3ad   :  { %2255 = vpow2.f32 %v651_v59  ;;  %v467_v27 = vsub.f32 %v2672_v51, %v457_v26  ;;  %2018 = vmatprep.subr.bf16.mxu0 %v746_v20 }
 0x3ae   :  { %2019 = vmatpush3.bf16.msra.mxu0 %v746_v20  ;;  %2257 = vpow2.f32 %v387_v22 }
 0x3af   :  { %v2748_v29 = vpop.eup %2251  ;;  %v471_v21 = vmul.f32 1.442695, %v467_v27  ;;  %v473_v27 = vmul.f32 1.442695, %v468_v19 }
 0x3b0   :  { %v545_v24 = vpop.xlane.xlu0 %544  ;;  %v485_v63 = vsel %vm366_vm1, %v2748_v29, 0.0  ;;  %v752_v43 = vpop.permute.xlu1 %751 }
 0x3b1   :  { %v555_v32 = vsub.f32 %v2678_v5, %v545_v24  ;;  %486 = vadd.xlane.f32.xlu1 %v485_v63  ;;  %2259 = vpow2.f32 %v471_v21 }
 0x3b3   :  { %v2753_v40 = vpop.eup %2253  ;;  %v559_v33 = vmul.f32 1.442695, %v555_v32 }
 0x3b4   :  { %v633_v35 = vpop.xlane.xlu0 %632  ;;  %v573_v51 = vsel %vm366_vm1, %v2753_v40, 0.0 }
 0x3b5   :  { %v643_v54 = vsub.f32 %v2685_v62, %v633_v35  ;;  %574 = vadd.xlane.f32.xlu1 %v573_v51  ;;  %2261 = vpow2.f32 %v559_v33 }
 0x3b7   :  { %v2758_v37 = vpop.eup %2255  ;;  %v647_v38 = vmul.f32 1.442695, %v643_v54 }
 0x3b8   :  { %v466_v39 = vpop.xlane.xlu0 %465  ;;  %v661_v5 = vsel %vm366_vm1, %v2758_v37, 0.0  ;;  %v2762_v45 = vpop.eup %2257 }
 0x3b9   :  { %v470_v46 = vsub.f32 %v2694_v17, %v466_v39  ;;  %662 = vadd.xlane.f32.xlu1 %v661_v5  ;;  %2263 = vpow2.f32 %v647_v38  ;;  %v397_v62 = vsel %vm366_vm1, %v2762_v45, 0.0  ;;  %v379_v5 = vsub.f32 %v2652_v28, %v2740_v14 }
 0x3bb   :  { %v477_v49 = vmul.f32 1.442695, %v470_v46  ;;  %v2767_v60 = vpop.eup %2259 }
 0x3bc   :  { %v554_v50 = vpop.xlane.xlu0 %553  ;;  %v479_v7 = vsel %vm366_vm1, %v2767_v60, 0.0 }
 0x3bd   :  { %2265 = vpow2.f32 %v477_v49  ;;  %v558_v1 = vsub.f32 %v2700_v23, %v554_v50  ;;  %398 = vadd.xlane.f32.xlu1 %v397_v62  ;;  %v383_v49 = vmul.f32 1.442695, %v379_v5 }
 0x3bf   :  { %v565_v3 = vmul.f32 1.442695, %v558_v1  ;;  %v2772_v8 = vpop.eup %2261 }
 0x3c0   :  { %v642_v6 = vpop.xlane.xlu0 %641  ;;  %v567_v13 = vsel %vm366_vm1, %v2772_v8, 0.0 }
 0x3c1   :  { %2267 = vpow2.f32 %v565_v3  ;;  %v646_v17 = vsub.f32 %v2709_v31, %v642_v6  ;;  %480 = vadd.xlane.f32.xlu1 %v479_v7 }
 0x3c3   :  { %v653_v10 = vmul.f32 1.442695, %v646_v17  ;;  %v2777_v61 = vpop.eup %2263 }
 0x3c4   :  { %v548_v11 = vpop.xlane.xlu0 %547  ;;  %v655_v48 = vsel %vm366_vm1, %v2777_v61, 0.0 }
 0x3c5   :  { %2269 = vpow2.f32 %v653_v10  ;;  %568 = vadd.xlane.f32.xlu1 %v567_v13  ;;  %v556_v21 = vsub.f32 %v2717_v0, %v548_v11 }
 0x3c7   :  { %v2779_v23 = vpop.eup %2265  ;;  %v561_v18 = vmul.f32 1.442695, %v556_v21 }
 0x3c8   :  { %v636_v15 = vpop.xlane.xlu0 %635  ;;  %v488_v16 = vsel %vm366_vm1, %v2779_v23, 0.0 }
 0x3c9   :  { %489 = vadd.xlane.f32.xlu0 %v488_v16  ;;  %656 = vadd.xlane.f32.xlu1 %v655_v48 }
 0x3cb   :  { %v2785_v31 = vpop.eup %2267 }
 0x3cc   :  { %v378_v22 = vpop.xlane.xlu0 %377  ;;  %v576_v59 = vsel %vm366_vm1, %v2785_v31, 0.0 }
 0x3cd   :  { %v382_v26 = vsub.f32 %v2727_v47, %v378_v22  ;;  %577 = vadd.xlane.f32.xlu0 %v576_v59  ;;  %v644_v47 = vsub.f32 %v2722_v44, %v636_v15 }
 0x3cf   :  { %v2792_v20 = vpop.eup %2269  ;;  %v389_v24 = vmul.f32 1.442695, %v382_v26  ;;  %v649_v33 = vmul.f32 1.442695, %v644_v47 }
 0x3d0   :  { %v748_v63 = vpop.permute.xlu0 %747  ;;  %v664_v32 = vsel %vm366_vm1, %v2792_v20, 0.0 }
 0x3d1   :  { %2271 = vpow2.f32 %v389_v24  ;;  %665 = vadd.xlane.f32.xlu0 %v664_v32  ;;  %2020 = vmatprep.subr.bf16.mxu0 %v748_v63 }
 0x3d2   :  { %2021 = vmatpush3.bf16.msra.mxu0 %v748_v63  ;;  %2273 = vpow2.f32 %v473_v27 }
 0x3d3   :  { %2022 = vmatprep.subr.bf16.mxu0 %v752_v43  ;;  %2275 = vpow2.f32 %v561_v18 }
 0x3d4   :  { %2277 = vpow2.f32 %v649_v33 }
 0x3d5   :  { %2279 = vpow2.f32 %v383_v49 }
 0x3d6   :  { %2023 = vmatpush3.bf16.msra.mxu0 %v752_v43 }
 0x3da   :  { %753 = vrot.lane.b32.xlu1 %v2563_v34, %s2424_s22 }
 0x3db   :  { %v2800_v0 = vpop.eup %2271 }
 0x3dc   :  { %v400_v35 = vsel %vm366_vm1, %v2800_v0, 0.0  ;;  %v2804_v51 = vpop.eup %2273 }
 0x3dd   :  { %401 = vadd.xlane.f32.xlu0 %v400_v35  ;;  %v482_v54 = vsel %vm366_vm1, %v2804_v51, 0.0  ;;  %v2808_v44 = vpop.eup %2275 }
 0x3de   :  { %v570_v38 = vsel %vm366_vm1, %v2808_v44, 0.0  ;;  %v2812_v39 = vpop.eup %2277 }
 0x3df   :  { %v658_v46 = vsel %vm366_vm1, %v2812_v39, 0.0  ;;  %v2818_v50 = vpop.eup %2279 }
 0x3e0   :  { %v391_v62 = vsel %vm366_vm1, %v2818_v50, 0.0 }
 0x3e1   :  { %483 = vadd.xlane.f32.xlu0 %v482_v54 }
 0x3e5   :  { %571 = vadd.xlane.f32.xlu0 %v570_v38 }
 0x3e9   :  { %659 = vadd.xlane.f32.xlu0 %v658_v46 }
 0x3fe   :  { %392 = vadd.xlane.f32.xlu1 %v391_v62 }
 0x3ff   :  { %757 = vrot.lane.b32.xlu0 %v2565_v36, %s2425_s4 }
 0x401   :  { %v372_v1 = vpop.xlane.xlu0 %371 }
 0x402   :  { %v380_v3 = vsub.f32 %v2735_v53, %v372_v1 }
 0x404   :  { %v385_v28 = vmul.f32 1.442695, %v380_v3 }
 0x406   :  { %2281 = vpow2.f32 %v385_v28 }
 0x410   :  { %v2825_v14 = vpop.eup %2281 }
 0x411   :  { %v394_v6 = vsel %vm366_vm1, %v2825_v14, 0.0 }
 0x41e   :  { %395 = vadd.xlane.f32.xlu0 %v394_v6 }
 0x43e   :  { %v487_v7 = vpop.xlane.xlu1 %486 }
 0x43f   :  { %2283 = vrcp.f32 %v487_v7 }
 0x442   :  { %v575_v17 = vpop.xlane.xlu1 %574 }
 0x443   :  { %2285 = vrcp.f32 %v575_v17 }
 0x446   :  { %v663_v10 = vpop.xlane.xlu1 %662 }
 0x449   :  { %v2284_v19 = vpop.eup %2283 }
 0x44a   :  { %v2829_v11 = vpop.xlane.xlu1 %398  ;;  %v497_v59 = vmul.f32 0.25, %v2284_v19 }
 0x44c   :  { %v501_v24 = vmul.f32 %v2748_v29, %v497_v59 }
 0x44d   :  { %v2286_v22 = vpop.eup %2285 }
 0x44e   :  { %v481_v13 = vpop.xlane.xlu1 %480  ;;  %v585_v21 = vmul.f32 0.25, %v2286_v22 }
 0x450   :  { %v589_v33 = vmul.f32 %v2753_v40, %v585_v21 }
 0x452   :  { %v569_v15 = vpop.xlane.xlu1 %568 }
 0x456   :  { %v490_v36 = vpop.xlane.xlu0 %489  ;;  %v657_v16 = vpop.xlane.xlu1 %656 }
 0x457   :  { %2287 = vrcp.f32 %v490_v36 }
 0x45a   :  { %v578_v53 = vpop.xlane.xlu0 %577  ;;  %v754_v48 = vpop.permute.xlu1 %753 }
 0x45b   :  { %2289 = vrcp.f32 %v578_v53  ;;  %2024 = vmatprep.subr.bf16.mxu0 %v754_v48 }
 0x45c   :  { %2025 = vmatpush3.bf16.msra.mxu0 %v754_v48  ;;  %2291 = vrcp.f32 %v481_v13 }
 0x45d   :  { %2293 = vrcp.f32 %v569_v15 }
 0x45e   :  { %v666_v18 = vpop.xlane.xlu0 %665 }
 0x461   :  { %v2288_v26 = vpop.eup %2287 }
 0x462   :  { %v498_v27 = vmul.f32 0.25, %v2288_v26 }
 0x464   :  { %v502_v63 = vmul.f32 %v2779_v23, %v498_v27 }
 0x465   :  { %v2290_v32 = vpop.eup %2289 }
 0x466   :  { %v586_v43 = vmul.f32 0.25, %v2290_v32  ;;  %v2157_v47 = vpack.i.bf16 %v502_v63, %v501_v24  ;;  %v2292_v23 = vpop.eup %2291 }
 0x467   :  { %v495_v46 = vmul.f32 0.25, %v2292_v23 }
 0x468   :  { %2158 = vrot.lane.b32.xlu0 %v2157_v47, %s2425_s4  ;;  %v590_v35 = vmul.f32 %v2785_v31, %v586_v43  ;;  %v2294_v31 = vpop.eup %2293 }
 0x469   :  { %v499_v28 = vmul.f32 %v2767_v60, %v495_v46  ;;  %v583_v6 = vmul.f32 0.25, %v2294_v31 }
 0x46a   :  { %v402_v54 = vpop.xlane.xlu0 %401  ;;  %v2162_v38 = vpack.i.bf16 %v590_v35, %v589_v33 }
 0x46b   :  { %v587_v36 = vmul.f32 %v2772_v8, %v583_v6 }
 0x46c   :  { %2163 = vrot.lane.b32.xlu0 %v2162_v38, %s2424_s22 }
 0x46e   :  { %v484_v5 = vpop.xlane.xlu0 %483 }
 0x46f   :  { %2295 = vrcp.f32 %v484_v5 }
 0x470   :  { %759 = vrot.lane.b32.xlu0 %v2563_v34, %s2425_s4  ;;  %2297 = vrcp.f32 %v657_v16 }
 0x472   :  { %v572_v29 = vpop.xlane.xlu0 %571 }
 0x473   :  { %2299 = vrcp.f32 %v572_v29 }
 0x474   :  { %2301 = vrcp.f32 %v666_v18 }
 0x475   :  { %2303 = vrcp.f32 %v663_v10 }
 0x476   :  { %v660_v40 = vpop.xlane.xlu0 %659 }
 0x477   :  { %2305 = vrcp.f32 %v660_v40 }
 0x479   :  { %v2296_v49 = vpop.eup %2295 }
 0x47a   :  { %v496_v62 = vmul.f32 0.25, %v2296_v49  ;;  %v758_v1 = vpop.permute.xlu0 %757  ;;  %v2298_v3 = vpop.eup %2297 }
 0x47b   :  { %2026 = vmatprep.subr.bf16.mxu0 %v758_v1  ;;  %v671_v16 = vmul.f32 0.25, %v2298_v3 }
 0x47c   :  { %2027 = vmatpush3.bf16.msra.mxu0 %v758_v1  ;;  %v500_v34 = vmul.f32 %v2804_v51, %v496_v62 }
 0x47d   :  { %v2300_v7 = vpop.eup %2299  ;;  %v675_v26 = vmul.f32 %v2777_v61, %v671_v16 }
 0x47e   :  { %v584_v17 = vmul.f32 0.25, %v2300_v7  ;;  %v2167_v13 = vpack.i.bf16 %v500_v34, %v499_v28  ;;  %v2302_v15 = vpop.eup %2301 }
 0x47f   :  { %v2304_v10 = vpop.eup %2303  ;;  %v674_v19 = vmul.f32 0.25, %v2302_v15 }
 0x480   :  { %2168 = vrot.lane.b32.xlu1 %v2167_v13, %s2425_s4  ;;  %v588_v53 = vmul.f32 %v2808_v44, %v584_v17  ;;  %v673_v59 = vmul.f32 0.25, %v2304_v10 }
 0x481   :  { %v2306_v48 = vpop.eup %2305  ;;  %v678_v21 = vmul.f32 %v2792_v20, %v674_v19 }
 0x482   :  { %v672_v22 = vmul.f32 0.25, %v2306_v48  ;;  %v2172_v60 = vpack.i.bf16 %v588_v53, %v587_v36  ;;  %v677_v8 = vmul.f32 %v2758_v37, %v673_v59 }
 0x484   :  { %v676_v51 = vmul.f32 %v2812_v39, %v672_v22  ;;  %2173 = vrot.lane.b32.xlu1 %v2172_v60, %s2424_s22  ;;  %v2182_v24 = vpack.i.bf16 %v678_v21, %v677_v8 }
 0x486   :  { %v2177_v27 = vpack.i.bf16 %v676_v51, %v675_v26 }
 0x488   :  { %2178 = vrot.lane.b32.xlu1 %v2177_v27, %s2423_s3 }
 0x48b   :  { %v393_v61 = vpop.xlane.xlu1 %392 }
 0x48c   :  { %2183 = vrot.lane.b32.xlu1 %v2182_v24, %s2423_s3  ;;  %2307 = vrcp.f32 %v393_v61 }
 0x496   :  { %v2308_v20 = vpop.eup %2307 }
 0x497   :  { %v407_v47 = vmul.f32 0.25, %v2308_v20 }
 0x499   :  { %v411_v49 = vmul.f32 %v2818_v50, %v407_v47 }
 0x4ab   :  { %v396_v44 = vpop.xlane.xlu0 %395 }
 0x4ac   :  { %2309 = vrcp.f32 %v396_v44 }
 0x4ad   :  { %2311 = vrcp.f32 %v2829_v11 }
 0x4ae   :  { %2313 = vrcp.f32 %v402_v54 }
 0x4b6   :  { %v2310_v39 = vpop.eup %2309 }
 0x4b7   :  { %v2312_v18 = vpop.eup %2311  ;;  %v408_v33 = vmul.f32 0.25, %v2310_v39 }
 0x4b8   :  { %v2314_v35 = vpop.eup %2313  ;;  %v409_v31 = vmul.f32 0.25, %v2312_v18 }
 0x4b9   :  { %v410_v46 = vmul.f32 0.25, %v2314_v35  ;;  %v412_v62 = vmul.f32 %v2825_v14, %v408_v33 }
 0x4ba   :  { %v413_v50 = vmul.f32 %v2762_v45, %v409_v31 }
 0x4bb   :  { %v414_v14 = vmul.f32 %v2800_v0, %v410_v46 }
 0x4da   :  { %v2159_v63 = vpop.permute.xlu0 %2158 }
 0x4db   :  { %v2161_v11 = vunpack.i.h.bf16 %v2159_v63  ;;  %v2160_v54 = vunpack.i.l.bf16 %v2159_v63 }
 0x4dd   :  { %v730_v48 = vsel %vm366_vm1, %v414_v14, %v2161_v11  ;;  %v729_v19 = vsel %vm366_vm1, %v413_v50, %v2160_v54  ;;  %v2249_v50 = vld [vmem:[%s3332_s9 + $0x30] sm:$0xff]  }
 0x4de   :  { %v2164_v32 = vpop.permute.xlu0 %2163 }
 0x4df   :  { %v2166_v7 = vunpack.i.h.bf16 %v2164_v32  ;;  %v2165_v17 = vunpack.i.l.bf16 %v2164_v32 }
 0x4e1   :  { %v735_v59 = vsel %vm731_vm3, %v730_v48, %v2166_v7  ;;  %v734_v26 = vsel %vm731_vm3, %v729_v19, %v2165_v17  ;;  %v2245_v7 = vld [vmem:[%s3332_s9 + $0x10] sm:$0xff]   ;;  %v2246_v17 = vld [vmem:[%s3332_s9 + $0x18] sm:$0xff]  }
 0x4e2   :  { %v760_v43 = vpop.permute.xlu0 %759 }
 0x4e3   :  { %2028 = vmatprep.subr.bf16.mxu0 %v760_v43 }
 0x4e4   :  { %2029 = vmatpush3.bf16.msra.mxu0 %v760_v43 }
 0x4f2   :  { %v2169_v37 = vpop.permute.xlu1 %2168 }
 0x4f3   :  { %v2171_v5 = vunpack.i.h.bf16 %v2169_v37  ;;  %v2170_v29 = vunpack.i.l.bf16 %v2169_v37 }
 0x4f5   :  { %v728_v3 = vsel %vm366_vm1, %v412_v62, %v2171_v5  ;;  %v727_v28 = vsel %vm366_vm1, %v411_v49, %v2170_v29 }
 0x4f6   :  { %v2174_v38 = vpop.permute.xlu1 %2173 }
 0x4f7   :  { %v2176_v23 = vunpack.i.h.bf16 %v2174_v38  ;;  %v2175_v40 = vunpack.i.l.bf16 %v2174_v38 }
 0x4f9   :  { %v732_v13 = vsel %vm731_vm3, %v727_v28, %v2175_v40  ;;  %v733_v15 = vsel %vm731_vm3, %v728_v3, %v2176_v23  ;;  %v2241_v3 = vld [vmem:[%s3331_s8] sm:$0xff]   ;;  %v2242_v28 = vld [vmem:[%s3331_s8 + $0x8] sm:$0xff]  }
 0x4fa   :  { %v2179_v1 = vpop.permute.xlu1 %2178  ;;  %2034 = vmatprep.subr.bf16.mxu1 %v2241_v3 }
 0x4fb   :  { %v2181_v6 = vunpack.i.h.bf16 %v2179_v1  ;;  %v2180_v34 = vunpack.i.l.bf16 %v2179_v1  ;;  %2035 = vmatpush3.bf16.msra.mxu1 %v2241_v3 }
 0x4fc   :  { %2036 = vmatprep.subr.bf16.mxu1 %v2242_v28 }
 0x4fd   :  { %v737_v10 = vsel %vm736_vm4, %v732_v13, %v2180_v34  ;;  %v738_v36 = vsel %vm736_vm4, %v733_v15, %v2181_v6  ;;  %v2243_v6 = vld [vmem:[%s3332_s9] sm:$0xff]   ;;  %v2244_v34 = vld [vmem:[%s3332_s9 + $0x8] sm:$0xff]  }
 0x4fe   :  { %v2184_v16 = vpop.permute.xlu1 %2183  ;;  %v741_v53 = vpack.c.bf16 %v738_v36, %v737_v10  ;;  %2042 = vmatprep.subr.bf16.mxu0 %v2243_v6  ;;  %v2247_v13 = vld [vmem:[%s3332_s9 + $0x20] sm:$0xff]   ;;  %v2248_v15 = vld [vmem:[%s3332_s9 + $0x28] sm:$0xff]  }
 0x4ff   :  { %v2186_v22 = vunpack.i.h.bf16 %v2184_v16  ;;  %v2185_v60 = vunpack.i.l.bf16 %v2184_v16  ;;  %2037 = vmatpush3.bf16.msra.mxu1 %v2242_v28 }
 0x500   :  { %2030 = vmatprep.mubr.bf16.mxu0 %v741_v53 }
 0x501   :  { %v740_v45 = vsel %vm736_vm4, %v735_v59, %v2186_v22  ;;  %v739_v0 = vsel %vm736_vm4, %v734_v26, %v2185_v60 }
 0x502   :  { %v742_v51 = vpack.c.bf16 %v740_v45, %v739_v0 }
 0x504   :  { %2031 = vmatmul.mubr.bf16.vlgmr.msra.gmra.mrb[4].mxu0 %v742_v51  ;;  %v1900_v51 = vld [vmem:[%s3329_s6] ss:$0 sm:$0xff] }
 0x505   :  { %2043 = vmatpush3.bf16.msra.mxu0 %v2243_v6 }
 0x506   :  { %2044 = vmatprep.subr.bf16.mxu0 %v2244_v34 }
 0x509   :  { %2045 = vmatpush3.bf16.msra.mxu0 %v2244_v34 }
 0x50a   :  { %2046 = vmatprep.subr.bf16.mxu0 %v2245_v7 }
 0x50d   :  { %2047 = vmatpush3.bf16.msra.mxu0 %v2245_v7 }
 0x50e   :  { %2048 = vmatprep.subr.bf16.mxu0 %v2246_v17 }
 0x511   :  { %2049 = vmatpush3.bf16.msra.mxu0 %v2246_v17 }
 0x512   :  { %2050 = vmatprep.subr.bf16.mxu0 %v2247_v13 }
 0x515   :  { %2051 = vmatpush3.bf16.msra.mxu0 %v2247_v13 }
 0x516   :  { %2052 = vmatprep.subr.bf16.mxu0 %v2248_v15 }
 0x519   :  { %2053 = vmatpush3.bf16.msra.mxu0 %v2248_v15 }
 0x51a   :  { %2054 = vmatprep.subr.bf16.mxu0 %v2249_v50 }
 0x51d   :  { %2055 = vmatpush3.bf16.msra.mxu0 %v2249_v50 }
 0x5d7   :  { %v2032_v27 = vpop.f32.mrb[4].mxu0 }
 0x5d8   :  { %v797_v21 = vpop.f32.mrb[5].mxu0  ;;  %v818_v32 = vsel %vm366_vm1, %v2032_v27, 0.0 }
 0x5d9   :  { %v2033_v8 = vpop.f32.mrb[6].mxu0  ;;  %v812_v24 = vsel %vm366_vm1, %v797_v21, 0.0 }
 0x5da   :  { %813 = vadd.xlane.f32.xlu0 %v812_v24  ;;  %v800_v44 = vpop.f32.mrb[7].mxu0  ;;  %v821_v43 = vsel %vm366_vm1, %v2033_v8, 0.0 }
 0x5db   :  { %v815_v63 = vsel %vm366_vm1, %v800_v44, 0.0 }
 0x5dc   :  { %816 = vadd.xlane.f32.xlu1 %v815_v63 }
 0x5de   :  { %819 = vadd.xlane.f32.xlu0 %v818_v32 }
 0x5e2   :  { %822 = vadd.xlane.f32.xlu0 %v821_v43 }
 0x667   :  { %v814_v61 = vpop.xlane.xlu0 %813 }
 0x668   :  { %v825_v20 = vmul.f32 0.03125, %v814_v61 }
 0x669   :  { %v817_v39 = vpop.xlane.xlu1 %816 }
 0x66a   :  { %v2872_v37 = vsub.f32 %v797_v21, %v825_v20  ;;  %v826_v18 = vmul.f32 0.03125, %v817_v39 }
 0x66b   :  { %v820_v47 = vpop.xlane.xlu0 %819 }
 0x66c   :  { %v2874_v33 = vsub.f32 %v800_v44, %v826_v18  ;;  %v827_v35 = vmul.f32 0.03125, %v820_v47  ;;  %v833_v38 = vmul.f32 %v2872_v37, %v2872_v37 }
 0x66e   :  { %v2878_v5 = vsub.f32 %v2032_v27, %v827_v35  ;;  %v837_v29 = vsel %vm366_vm1, %v833_v38, 0.0  ;;  %v834_v23 = vmul.f32 %v2874_v33, %v2874_v33 }
 0x66f   :  { %v823_v40 = vpop.xlane.xlu0 %822  ;;  %838 = vadd.xlane.f32.xlu1 %v837_v29 }
 0x670   :  { %v828_v31 = vmul.f32 0.03125, %v823_v40  ;;  %v840_v46 = vsel %vm366_vm1, %v834_v23, 0.0  ;;  %v835_v49 = vmul.f32 %v2878_v5, %v2878_v5 }
 0x671   :  { %841 = vadd.xlane.f32.xlu0 %v840_v46  ;;  %v2250_v46 = vld [vmem:[%s3332_s9 + $0x38] sm:$0xff]  }
 0x672   :  { %v2886_v62 = vsub.f32 %v2033_v8, %v828_v31  ;;  %v843_v11 = vsel %vm366_vm1, %v835_v49, 0.0  ;;  %v1901_v8 = vld [vmem:[%s3330_s7] ss:$0 sm:$0xff]  ;;  %2056 = vmatprep.subr.bf16.mxu0 %v2250_v46 }
 0x673   :  { %844 = vadd.xlane.f32.xlu1 %v843_v11  ;;  %2057 = vmatpush3.bf16.msra.mxu0 %v2250_v46 }
 0x674   :  { %v836_v54 = vmul.f32 %v2886_v62, %v2886_v62 }
 0x676   :  { %v846_v1 = vsel %vm366_vm1, %v836_v54, 0.0 }
 0x677   :  { %847 = vadd.xlane.f32.xlu0 %v846_v1 }
 0x6fc   :  { %v839_v14 = vpop.xlane.xlu1 %838 }
 0x6fd   :  { %v849_v10 = vmul.f32 0.03125, %v839_v14 }
 0x6fe   :  { %v842_v36 = vpop.xlane.xlu0 %841 }
 0x6ff   :  { %v853_v16 = vadd.f32 1e-05, %v849_v10  ;;  %v850_v53 = vmul.f32 0.03125, %v842_v36 }
 0x700   :  { %v845_v48 = vpop.xlane.xlu1 %844 }
 0x701   :  { %2315 = vrsqrt.f32 %v853_v16  ;;  %v854_v19 = vadd.f32 1e-05, %v850_v53  ;;  %v851_v22 = vmul.f32 0.03125, %v845_v48 }
 0x703   :  { %2317 = vrsqrt.f32 %v854_v19  ;;  %v855_v60 = vadd.f32 1e-05, %v851_v22 }
 0x704   :  { %v848_v59 = vpop.xlane.xlu0 %847 }
 0x705   :  { %2319 = vrsqrt.f32 %v855_v60  ;;  %v852_v26 = vmul.f32 0.03125, %v848_v59 }
 0x707   :  { %v856_v45 = vadd.f32 1e-05, %v852_v26 }
 0x709   :  { %2321 = vrsqrt.f32 %v856_v45 }
 0x70b   :  { %v2316_v0 = vpop.eup %2315 }
 0x70c   :  { %v861_v27 = vmul.f32 %v2316_v0, %v2872_v37 }
 0x70d   :  { %v2318_v21 = vpop.eup %2317 }
 0x70e   :  { %v862_v24 = vmul.f32 %v2318_v21, %v2874_v33  ;;  %v872_v44 = vmul.f32 %v1900_v51, %v861_v27 }
 0x70f   :  { %v2320_v63 = vpop.eup %2319 }
 0x710   :  { %v863_v32 = vmul.f32 %v2320_v63, %v2878_v5  ;;  %v873_v43 = vmul.f32 %v1900_v51, %v862_v24  ;;  %v2928_v61 = vadd.f32 %v1901_v8, %v872_v44 }
 0x712   :  { %v874_v20 = vmul.f32 %v1900_v51, %v863_v32  ;;  %v2930_v39 = vadd.f32 %v1901_v8, %v873_v43  ;;  %v887_v47 = vmax.f32 %v2928_v61, 0.0 }
 0x713   :  { %v2322_v18 = vpop.eup %2321 }
 0x714   :  { %v864_v37 = vmul.f32 %v2322_v18, %v2886_v62  ;;  %v888_v35 = vmax.f32 %v2930_v39, 0.0  ;;  %v2939_v5 = vadd.f32 %v1901_v8, %v874_v20 }
 0x716   :  { %v875_v38 = vmul.f32 %v1900_v51, %v864_v37  ;;  %v891_v33 = vpack.c.bf16 %v888_v35, %v887_v47  ;;  %v889_v23 = vmax.f32 %v2939_v5, 0.0 }
 0x718   :  { %2038 = vmatprep.mubr.msk.bf16.mxu1 %vm366_vm1, %v891_v33  ;;  %v2942_v29 = vadd.f32 %v1901_v8, %v875_v38 }
 0x71a   :  { %v890_v40 = vmax.f32 %v2942_v29, 0.0  ;;  %v1796_v29 = vld [vmem:[%s3337_s14 + $0x18] sm:$0xff] }
 0x71c   :  { %v892_v31 = vpack.c.bf16 %v890_v40, %v889_v23 }
 0x71e   :  { %2039 = vmatmul.mubr.msk.bf16.vlgmr.msra.gmra.mrb[4].mxu1 %vm366_vm1, %v892_v31 }
 0x7f1   :  { %v2040_v49 = vpop.f32.mrb[4].mxu1 }
 0x7f2   :  { %v949_v62 = vpop.f32.mrb[5].mxu1 }
 0x7f3   :  { %v2041_v11 = vpop.f32.mrb[6].mxu1 }
 0x7f4   :  { %v2954_v54 = vpack.c.bf16 %v2041_v11, %v2040_v49  ;;  %v952_v1 = vpop.f32.mrb[7].mxu1 }
 0x7f5   :  { %v2956_v3 = vpack.c.bf16 %v952_v1, %v949_v62 }
 0x7f7   :  { %2058 = vmatprep.mubr.bf16.mxu0 %v2956_v3  ;;  %2062 = vmatprep.subr.bf16.mxu1 %v2956_v3 }
 0x7f8   :  { %2059 = vmatmul.mubr.bf16.vlgmr.msra.gmra.mrb[8].mxu0 %v2954_v54  ;;  %2063 = vmatpush3.bf16.msra.mxu1 %v2956_v3 }
 0x7f9   :  { %2064 = vmatprep.subr.bf16.mxu1 %v2954_v54 }
 0x7fc   :  { %2065 = vmatpush3.bf16.msra.mxu1 %v2954_v54 }
 0x8cb   :  { %v2060_v28 = vpop.f32.mrb[8].mxu0 }
 0x8cc   :  { %1388 = vperm.xlu0 %2189, %v2060_v28   ;;  %1212 = vperm.xlu1 %2187, %v2060_v28   ;;  %v1064_v6 = vpop.f32.mrb[9].mxu0 }
 0x8cd   :  { %v2061_v34 = vpop.f32.mrb[10].mxu0 }
 0x8ce   :  { %v1067_v7 = vpop.f32.mrb[11].mxu0 }
 0x8d0   :  { %2190 = vset.pattern.permute.xlu0 %v2419_v2  ;;  %2188 = vset.pattern.permute.xlu1 %v2421_v41 }
 0x8d1   :  { %1123 = vperm.xlu0 %2190, %v2060_v28   ;;  %1300 = vperm.xlu1 %2188, %v2060_v28  }
 0x8d5   :  { %2191 = vset.pattern.permute.xlu1 %v2420_v30  ;;  %1113 = vperm.xlu0 %2190, %v1064_v6  }
 0x8d6   :  { %1204 = vperm.xlu1 %2191, %v1064_v6  }
 0x8d9   :  { %1128 = vperm.xlu0 %2190, %v2061_v34  }
 0x8da   :  { %2192 = vset.pattern.permute.xlu1 %v2421_v41 }
 0x8db   :  { %1292 = vperm.xlu1 %2192, %v1064_v6  }
 0x8dd   :  { %2197 = vset.pattern.permute.xlu0 %v2420_v30 }
 0x8de   :  { %1208 = vperm.xlu0 %2197, %v1067_v7  }
 0x8df   :  { %2193 = vset.pattern.permute.xlu1 %v2422_v42 }
 0x8e0   :  { %1380 = vperm.xlu1 %2193, %v1064_v6  }
 0x8e2   :  { %2200 = vset.pattern.permute.xlu0 %v2419_v2 }
 0x8e3   :  { %1118 = vperm.xlu0 %2200, %v1067_v7  }
 0x8e4   :  { %2194 = vset.pattern.permute.xlu1 %v2420_v30 }
 0x8e5   :  { %1216 = vperm.xlu1 %2194, %v2061_v34  }
 0x8e7   :  { %2231 = vset.pattern.permute.xlu0 %v2422_v42 }
 0x8e9   :  { %2195 = vset.pattern.permute.xlu1 %v2421_v41 }
 0x8ea   :  { %1304 = vperm.xlu1 %2195, %v2061_v34  }
 0x8ee   :  { %2196 = vset.pattern.permute.xlu1 %v2422_v42 }
 0x8ef   :  { %1392 = vperm.xlu1 %2196, %v2061_v34  }
 0x8f3   :  { %2198 = vset.pattern.permute.xlu1 %v2421_v41 }
 0x8f4   :  { %1296 = vperm.xlu1 %2198, %v1067_v7  }
 0x8f8   :  { %2199 = vset.pattern.permute.xlu1 %v2422_v42 }
 0x8f9   :  { %1384 = vperm.xlu1 %2199, %v1067_v7  }
 0x922   :  { %1079 = vxpose.xlu1.b32.start [1/4] (short) (narrow) %v1064_v6, 8 }
 0x926   :  { %1080 = vxpose.xlu1.b32.cont [2/4] (short) (narrow) %v1067_v7, 8 }
 0x92a   :  { %1081 = vxpose.xlu1.b32.cont [3/4] (short) (narrow) %v2060_v28, 8 }
 0x92e   :  { %1082 = vxpose.xlu1.b32.end [4/4] (short) (narrow) %v2061_v34, 8 }
 0x94b   :  { %v1213_v2 = vpop.permute.xlu1 %1212  ;;  %v1389_v41 = vpop.permute.xlu0 %1388 }
 0x950   :  { %v1301_v30 = vpop.permute.xlu1 %1300  ;;  %v1124_v42 = vpop.permute.xlu0 %1123 }
 0x954   :  { %v1114_v59 = vpop.permute.xlu0 %1113 }
 0x955   :  { %v1205_v17 = vpop.permute.xlu1 %1204 }
 0x95a   :  { %v1293_v13 = vpop.permute.xlu1 %1292 }
 0x95f   :  { %v1381_v15 = vpop.permute.xlu1 %1380 }
 0x964   :  { %v1217_v50 = vpop.permute.xlu1 %1216 }
 0x969   :  { %v2977_v14 = vpop.permute.xlu1 %1304 }
 0x96e   :  { %v2979_v10 = vpop.permute.xlu1 %1392 }
 0x973   :  { %v2981_v36 = vpop.permute.xlu1 %1296 }
 0x978   :  { %v2983_v16 = vpop.permute.xlu1 %1384 }
 0x9a2   :  { %v1095_v53 = vpop.trf.xlu1 }
 0x9a3   :  { %v2987_v48 = vrot.slane %v1095_v53, %v344_v55  ;;  %v2991_v19 = vrot.slane %v1095_v53, %v433_v56  ;;  %v2995_v22 = vrot.slane %v1095_v53, %v521_v57  ;;  %v2999_v60 = vrot.slane %v1095_v53, %v609_v58  ;;  %v1129_v53 = vpop.permute.xlu0 %1128 }
 0x9a5   :  { %v1225_v26 = vadd.f32 %v2991_v19, %v1213_v2  ;;  %v1313_v45 = vadd.f32 %v2995_v22, %v1301_v30  ;;  %v1137_v55 = vadd.f32 %v2987_v48, %v1124_v42  ;;  %v1401_v0 = vadd.f32 %v2999_v60, %v1389_v41 }
 0x9a6   :  { %v1135_v56 = vadd.f32 %v2987_v48, %v1114_v59  ;;  %v1223_v51 = vadd.f32 %v2991_v19, %v1205_v17  ;;  %v1311_v57 = vadd.f32 %v2995_v22, %v1293_v13  ;;  %v1399_v62 = vadd.f32 %v2999_v60, %v1381_v15 }
 0x9a7   :  { %vm1229_vm5 = vcmp.gt.f32.partialorder %v1225_v26, 0.0  ;;  %v1233_v27 = vmul.f32 0.2, %v1225_v26  ;;  %vm1317_vm6 = vcmp.gt.f32.partialorder %v1313_v45, 0.0  ;;  %v1321_v52 = vmul.f32 0.2, %v1313_v45 }
 0x9a8   :  { %vm1141_vm7 = vcmp.gt.f32.partialorder %v1137_v55, 0.0  ;;  %v1145_v58 = vmul.f32 0.2, %v1137_v55  ;;  %vm1405_vm8 = vcmp.gt.f32.partialorder %v1401_v0, 0.0  ;;  %v1409_v21 = vmul.f32 0.2, %v1401_v0 }
 0x9a9   :  { %v1237_v8 = vsel %vm1229_vm5, %v1225_v26, %v1233_v27  ;;  %v1325_v24 = vsel %vm1317_vm6, %v1313_v45, %v1321_v52  ;;  %vm1139_vm9 = vcmp.gt.f32.partialorder %v1135_v56, 0.0  ;;  %v1143_v44 = vmul.f32 0.2, %v1135_v56 }
 0x9aa   :  { %v3009_v63 = vadd.f32 %v2625_v4, %v1237_v8  ;;  %v3012_v32 = vadd.f32 %v2625_v4, %v1325_v24  ;;  %v1149_v43 = vsel %vm1141_vm7, %v1137_v55, %v1145_v58  ;;  %v1413_v20 = vsel %vm1405_vm8, %v1401_v0, %v1409_v21  ;;  %v1209_v0 = vpop.permute.xlu0 %1208 }
 0x9ab   :  { %v3015_v18 = vadd.f32 %v2625_v4, %v1149_v43  ;;  %vm1227_vm10 = vcmp.gt.f32.partialorder %v1223_v51, 0.0  ;;  %v3022_v33 = vadd.f32 %v2625_v4, %v1413_v20  ;;  %v1231_v31 = vmul.f32 0.2, %v1223_v51 }
 0x9ac   :  { %v1249_v37 = vsel %vm366_vm1, %v3009_v63, -inf  ;;  %v1337_v38 = vsel %vm366_vm1, %v3012_v32, -inf  ;;  %v1147_v46 = vsel %vm1139_vm9, %v1135_v56, %v1143_v44  ;;  %v1319_v49 = vmul.f32 0.2, %v1311_v57 }
 0x9ad   :  { %1250 = vmax.xlane.f32.xlu1 %v1249_v37  ;;  %1338 = vmax.xlane.f32.xlu0 %v1337_v38  ;;  %v1235_v11 = vsel %vm1227_vm10, %v1223_v51, %v1231_v31  ;;  %vm1315_vm11 = vcmp.gt.f32.partialorder %v1311_v57, 0.0  ;;  %v1161_v1 = vsel %vm366_vm1, %v3015_v18, -inf  ;;  %v1425_v28 = vsel %vm366_vm1, %v3022_v33, -inf }
 0x9ae   :  { %v3030_v6 = vadd.f32 %v2631_v9, %v1147_v46  ;;  %v3033_v4 = vadd.f32 %v2631_v9, %v1235_v11  ;;  %v1323_v34 = vsel %vm1315_vm11, %v1311_v57, %v1319_v49  ;;  %v1407_v7 = vmul.f32 0.2, %v1399_v62 }
 0x9af   :  { %v1226_v2 = vadd.f32 %v2991_v19, %v1217_v50  ;;  %vm1403_vm12 = vcmp.gt.f32.partialorder %v1399_v62, 0.0  ;;  %v3041_v13 = vadd.f32 %v2631_v9, %v1323_v34  ;;  %v1314_v42 = vadd.f32 %v2995_v22, %v2977_v14 }
 0x9b0   :  { %v1155_v30 = vsel %vm366_vm1, %v3030_v6, -inf  ;;  %v1243_v17 = vsel %vm366_vm1, %v3033_v4, -inf  ;;  %v1411_v15 = vsel %vm1403_vm12, %v1399_v62, %v1407_v7  ;;  %v1402_v55 = vadd.f32 %v2999_v60, %v2979_v10  ;;  %v1119_v7 = vpop.permute.xlu0 %1118 }
 0x9b1   :  { %1162 = vmax.xlane.f32.xlu1 %v1161_v1  ;;  %1426 = vmax.xlane.f32.xlu0 %v1425_v28  ;;  %v1234_v41 = vmul.f32 0.2, %v1226_v2  ;;  %vm1230_vm13 = vcmp.gt.f32.partialorder %v1226_v2, 0.0  ;;  %v1331_v50 = vsel %vm366_vm1, %v3041_v13, -inf  ;;  %v3048_v59 = vadd.f32 %v2631_v9, %v1411_v15 }
 0x9b2   :  { %v1322_v45 = vmul.f32 0.2, %v1314_v42  ;;  %vm1318_vm14 = vcmp.gt.f32.partialorder %v1314_v42, 0.0  ;;  %v1410_v57 = vmul.f32 0.2, %v1402_v55  ;;  %v1224_v9 = vadd.f32 %v2991_v19, %v1209_v0 }
 0x9b3   :  { %v1238_v26 = vsel %vm1230_vm13, %v1226_v2, %v1234_v41  ;;  %v1419_v56 = vsel %vm366_vm1, %v3048_v59, -inf  ;;  %vm1406_vm15 = vcmp.gt.f32.partialorder %v1402_v55, 0.0  ;;  %v1312_v21 = vadd.f32 %v2995_v22, %v2981_v36 }
 0x9b4   :  { %v3055_v14 = vadd.f32 %v2688_v12, %v1238_v26  ;;  %v1326_v51 = vsel %vm1318_vm14, %v1314_v42, %v1322_v45  ;;  %v1414_v10 = vsel %vm1406_vm15, %v1402_v55, %v1410_v57  ;;  %v1232_v58 = vmul.f32 0.2, %v1224_v9 }
 0x9b5   :  { %1156 = vmax.xlane.f32.xlu1 %v1155_v30  ;;  %1244 = vmax.xlane.f32.xlu0 %v1243_v17  ;;  %v3061_v52 = vadd.f32 %v2688_v12, %v1326_v51  ;;  %vm1228_vm0 = vcmp.gt.f32.partialorder %v1224_v9, 0.0  ;;  %v3068_v24 = vadd.f32 %v2688_v12, %v1414_v10  ;;  %v1320_v44 = vmul.f32 0.2, %v1312_v21 }
 0x9b6   :  { %v1252_v27 = vsel %vm366_vm1, %v3055_v14, -inf  ;;  %v1236_v19 = vsel %vm1228_vm0, %v1224_v9, %v1232_v58  ;;  %v1400_v43 = vadd.f32 %v2999_v60, %v2983_v16  ;;  %vm1316_vm2 = vcmp.gt.f32.partialorder %v1312_v21, 0.0 }
 0x9b7   :  { %v1340_v8 = vsel %vm366_vm1, %v3061_v52, -inf  ;;  %v1428_v36 = vsel %vm366_vm1, %v3068_v24, -inf  ;;  %v3077_v22 = vadd.f32 %v2645_v25, %v1236_v19  ;;  %v1324_v20 = vsel %vm1316_vm2, %v1312_v21, %v1320_v44 }
 0x9b8   :  { %v1408_v37 = vmul.f32 0.2, %v1400_v43  ;;  %v1138_v38 = vadd.f32 %v2987_v48, %v1129_v53  ;;  %vm1404_vm5 = vcmp.gt.f32.partialorder %v1400_v43, 0.0  ;;  %v3085_v60 = vadd.f32 %v2645_v25, %v1324_v20 }
 0x9b9   :  { %1332 = vmax.xlane.f32.xlu0 %v1331_v50  ;;  %v1246_v16 = vsel %vm366_vm1, %v3077_v22, -inf  ;;  %v1136_v2 = vadd.f32 %v2987_v48, %v1119_v7 }
 0x9ba   :  { %v1412_v31 = vsel %vm1404_vm5, %v1400_v43, %v1408_v37  ;;  %v1146_v46 = vmul.f32 0.2, %v1138_v38  ;;  %vm1142_vm6 = vcmp.gt.f32.partialorder %v1138_v38, 0.0  ;;  %v1334_v49 = vsel %vm366_vm1, %v3085_v60, -inf }
 0x9bb   :  { %v3090_v62 = vadd.f32 %v2645_v25, %v1412_v31  ;;  %v1144_v30 = vmul.f32 0.2, %v1136_v2  ;;  %vm1140_vm7 = vcmp.gt.f32.partialorder %v1136_v2, 0.0 }
 0x9bc   :  { %v1150_v11 = vsel %vm1142_vm6, %v1138_v38, %v1146_v46 }
 0x9bd   :  { %1420 = vmax.xlane.f32.xlu0 %v1419_v56  ;;  %v1422_v1 = vsel %vm366_vm1, %v3090_v62, -inf  ;;  %v3095_v28 = vadd.f32 %v2688_v12, %v1150_v11  ;;  %v1148_v17 = vsel %vm1140_vm7, %v1136_v2, %v1144_v30 }
 0x9be   :  { %v3103_v15 = vadd.f32 %v2645_v25, %v1148_v17 }
 0x9bf   :  { %v1164_v34 = vsel %vm366_vm1, %v3095_v28, -inf }
 0x9c0   :  { %v1158_v12 = vsel %vm366_vm1, %v3103_v15, -inf }
 0x9c1   :  { %1253 = vmax.xlane.f32.xlu0 %v1252_v27 }
 0x9c5   :  { %1341 = vmax.xlane.f32.xlu0 %v1340_v8 }
 0x9c6   :  { %1531 = vrot.lane.b32.xlu1 %v2956_v3, %s2423_s3 }
 0x9c9   :  { %1429 = vmax.xlane.f32.xlu0 %v1428_v36 }
 0x9ca   :  { %1537 = vrot.lane.b32.xlu1 %v2956_v3, %s2424_s22 }
 0x9cd   :  { %1247 = vmax.xlane.f32.xlu0 %v1246_v16 }
 0x9d1   :  { %1335 = vmax.xlane.f32.xlu0 %v1334_v49 }
 0x9d5   :  { %1423 = vmax.xlane.f32.xlu0 %v1422_v1 }
 0x9d9   :  { %1165 = vmax.xlane.f32.xlu0 %v1164_v34 }
 0x9ef   :  { %1533 = vrot.lane.b32.xlu0 %v2954_v54, %s2423_s3 }
 0xa0e   :  { %1159 = vmax.xlane.f32.xlu0 %v1158_v12 }
 0xa3a   :  { %v1251_v41 = vpop.xlane.xlu1 %1250  ;;  %v1339_v42 = vpop.xlane.xlu0 %1338 }
 0xa3b   :  { %v1257_v53 = vsub.f32 %v3009_v63, %v1251_v41  ;;  %v1345_v50 = vsub.f32 %v3012_v32, %v1339_v42 }
 0xa3d   :  { %v1263_v26 = vmul.f32 1.442695, %v1257_v53  ;;  %v1351_v45 = vmul.f32 1.442695, %v1345_v50 }
 0xa3e   :  { %v1163_v55 = vpop.xlane.xlu1 %1162  ;;  %v1427_v48 = vpop.xlane.xlu0 %1426 }
 0xa3f   :  { %2323 = vpow2.f32 %v1263_v26  ;;  %v1433_v0 = vsub.f32 %v3022_v33, %v1427_v48  ;;  %v1169_v25 = vsub.f32 %v3015_v18, %v1163_v55 }
 0xa40   :  { %2325 = vpow2.f32 %v1351_v45 }
 0xa41   :  { %v1439_v56 = vmul.f32 1.442695, %v1433_v0  ;;  %v1175_v9 = vmul.f32 1.442695, %v1169_v25 }
 0xa42   :  { %v3111_v51 = vpop.xlane.xlu1 %1156  ;;  %v1245_v57 = vpop.xlane.xlu0 %1244 }
 0xa43   :  { %2327 = vpow2.f32 %v1439_v56  ;;  %v1255_v63 = vsub.f32 %v3033_v4, %v1245_v57 }
 0xa44   :  { %2329 = vpow2.f32 %v1175_v9 }
 0xa45   :  { %v1259_v58 = vmul.f32 1.442695, %v1255_v63 }
 0xa46   :  { %v1532_v27 = vpop.permute.xlu1 %1531  ;;  %v1333_v32 = vpop.xlane.xlu0 %1332 }
 0xa47   :  { %2066 = vmatprep.subr.bf16.mxu1 %v1532_v27  ;;  %v1343_v33 = vsub.f32 %v3041_v13, %v1333_v32  ;;  %2331 = vpow2.f32 %v1259_v58 }
 0xa48   :  { %2067 = vmatpush3.bf16.msra.mxu1 %v1532_v27 }
 0xa49   :  { %v3114_v10 = vpop.eup %2323  ;;  %v1347_v19 = vmul.f32 1.442695, %v1343_v33 }
 0xa4a   :  { %v1421_v21 = vpop.xlane.xlu0 %1420  ;;  %v1273_v18 = vsel %vm366_vm1, %v3114_v10, 0.0  ;;  %v3119_v8 = vpop.eup %2325 }
 0xa4b   :  { %1274 = vadd.xlane.f32.xlu1 %v1273_v18  ;;  %v1431_v4 = vsub.f32 %v3048_v59, %v1421_v21  ;;  %v1361_v43 = vsel %vm366_vm1, %v3119_v8, 0.0  ;;  %2333 = vpow2.f32 %v1347_v19  ;;  %v1538_v27 = vpop.permute.xlu1 %1537 }
 0xa4d   :  { %v3124_v36 = vpop.eup %2327  ;;  %v1435_v13 = vmul.f32 1.442695, %v1431_v4  ;;  %v1167_v4 = vsub.f32 %v3030_v6, %v3111_v51 }
 0xa4e   :  { %v1254_v44 = vpop.xlane.xlu0 %1253  ;;  %v1449_v16 = vsel %vm366_vm1, %v3124_v36, 0.0  ;;  %v3129_v31 = vpop.eup %2329 }
 0xa4f   :  { %v1258_v20 = vsub.f32 %v3055_v14, %v1254_v44  ;;  %1362 = vadd.xlane.f32.xlu1 %v1361_v43  ;;  %v1185_v14 = vsel %vm366_vm1, %v3129_v31, 0.0  ;;  %v1171_v43 = vmul.f32 1.442695, %v1167_v4 }
 0xa51   :  { %v1265_v37 = vmul.f32 1.442695, %v1258_v20  ;;  %v3134_v11 = vpop.eup %2331 }
 0xa52   :  { %v1342_v38 = vpop.xlane.xlu0 %1341  ;;  %v1267_v2 = vsel %vm366_vm1, %v3134_v11, 0.0 }
 0xa53   :  { %2335 = vpow2.f32 %v1265_v37  ;;  %v1346_v59 = vsub.f32 %v3061_v52, %v1342_v38  ;;  %1450 = vadd.xlane.f32.xlu1 %v1449_v16 }
 0xa54   :  { %2337 = vpow2.f32 %v1435_v13 }
 0xa55   :  { %v1353_v46 = vmul.f32 1.442695, %v1346_v59  ;;  %v3139_v30 = vpop.eup %2333 }
 0xa56   :  { %v1430_v49 = vpop.xlane.xlu0 %1429  ;;  %v1355_v12 = vsel %vm366_vm1, %v3139_v30, 0.0 }
 0xa57   :  { %2339 = vpow2.f32 %v1353_v46  ;;  %v1434_v1 = vsub.f32 %v3068_v24, %v1430_v49  ;;  %1186 = vadd.xlane.f32.xlu1 %v1185_v14 }
 0xa59   :  { %v1441_v34 = vmul.f32 1.442695, %v1434_v1 }
 0xa5a   :  { %v1248_v7 = vpop.xlane.xlu0 %1247 }
 0xa5b   :  { %2341 = vpow2.f32 %v1441_v34  ;;  %1268 = vadd.xlane.f32.xlu1 %v1267_v2  ;;  %v1256_v55 = vsub.f32 %v3077_v22, %v1248_v7 }
 0xa5d   :  { %v3141_v52 = vpop.eup %2335  ;;  %v1261_v56 = vmul.f32 1.442695, %v1256_v55 }
 0xa5e   :  { %v1336_v17 = vpop.xlane.xlu0 %1335  ;;  %v1276_v41 = vsel %vm366_vm1, %v3141_v52, 0.0  ;;  %v3147_v24 = vpop.eup %2337 }
 0xa5f   :  { %1356 = vadd.xlane.f32.xlu1 %v1355_v12  ;;  %1277 = vadd.xlane.f32.xlu0 %v1276_v41  ;;  %v1443_v50 = vsel %vm366_vm1, %v3147_v24, 0.0  ;;  %v1344_v57 = vsub.f32 %v3085_v60, %v1336_v17 }
 0xa61   :  { %v3149_v42 = vpop.eup %2339  ;;  %v1349_v32 = vmul.f32 1.442695, %v1344_v57 }
 0xa62   :  { %v1424_v53 = vpop.xlane.xlu0 %1423  ;;  %v1364_v26 = vsel %vm366_vm1, %v3149_v42, 0.0 }
 0xa63   :  { %1444 = vadd.xlane.f32.xlu1 %v1443_v50  ;;  %1365 = vadd.xlane.f32.xlu0 %v1364_v26  ;;  %v1432_v22 = vsub.f32 %v3090_v62, %v1424_v53 }
 0xa65   :  { %v3155_v45 = vpop.eup %2341  ;;  %v1437_v58 = vmul.f32 1.442695, %v1432_v22 }
 0xa66   :  { %v1166_v48 = vpop.xlane.xlu0 %1165  ;;  %v1452_v0 = vsel %vm366_vm1, %v3155_v45, 0.0 }
 0xa67   :  { %v1170_v25 = vsub.f32 %v3095_v28, %v1166_v48  ;;  %1453 = vadd.xlane.f32.xlu0 %v1452_v0 }
 0xa69   :  { %v1177_v9 = vmul.f32 1.442695, %v1170_v25 }
 0xa6a   :  { %v1534_v63 = vpop.permute.xlu0 %1533 }
 0xa6b   :  { %2343 = vpow2.f32 %v1177_v9  ;;  %2068 = vmatprep.subr.bf16.mxu1 %v1534_v63 }
 0xa6c   :  { %2069 = vmatpush3.bf16.msra.mxu1 %v1534_v63  ;;  %2345 = vpow2.f32 %v1261_v56 }
 0xa6d   :  { %2070 = vmatprep.subr.bf16.mxu1 %v1538_v27  ;;  %2347 = vpow2.f32 %v1349_v32 }
 0xa6e   :  { %2349 = vpow2.f32 %v1437_v58 }
 0xa6f   :  { %2351 = vpow2.f32 %v1171_v43 }
 0xa70   :  { %2071 = vmatpush3.bf16.msra.mxu1 %v1538_v27 }
 0xa74   :  { %1539 = vrot.lane.b32.xlu1 %v2954_v54, %s2424_s22 }
 0xa75   :  { %v3165_v28 = vpop.eup %2343 }
 0xa76   :  { %v1188_v60 = vsel %vm366_vm1, %v3165_v28, 0.0  ;;  %v3169_v33 = vpop.eup %2345 }
 0xa77   :  { %1189 = vadd.xlane.f32.xlu0 %v1188_v60  ;;  %v1270_v21 = vsel %vm366_vm1, %v3169_v33, 0.0  ;;  %v3173_v62 = vpop.eup %2347 }
 0xa78   :  { %v1358_v18 = vsel %vm366_vm1, %v3173_v62, 0.0  ;;  %v3177_v19 = vpop.eup %2349 }
 0xa79   :  { %v1446_v44 = vsel %vm366_vm1, %v3177_v19, 0.0  ;;  %v3183_v20 = vpop.eup %2351 }
 0xa7a   :  { %v1179_v13 = vsel %vm366_vm1, %v3183_v20, 0.0 }
 0xa7b   :  { %1271 = vadd.xlane.f32.xlu0 %v1270_v21 }
 0xa7f   :  { %1359 = vadd.xlane.f32.xlu0 %v1358_v18 }
 0xa83   :  { %1447 = vadd.xlane.f32.xlu0 %v1446_v44 }
 0xa98   :  { %1180 = vadd.xlane.f32.xlu1 %v1179_v13 }
 0xa99   :  { %1543 = vrot.lane.b32.xlu0 %v2956_v3, %s2425_s4 }
 0xa9b   :  { %v1160_v37 = vpop.xlane.xlu0 %1159 }
 0xa9c   :  { %v1168_v38 = vsub.f32 %v3103_v15, %v1160_v37 }
 0xa9e   :  { %v1173_v16 = vmul.f32 1.442695, %v1168_v38 }
 0xaa0   :  { %2353 = vpow2.f32 %v1173_v16 }
 0xaaa   :  { %v3190_v6 = vpop.eup %2353 }
 0xaab   :  { %v1182_v51 = vsel %vm366_vm1, %v3190_v6, 0.0 }
 0xab8   :  { %1183 = vadd.xlane.f32.xlu0 %v1182_v51 }
 0xad8   :  { %v1275_v59 = vpop.xlane.xlu1 %1274 }
 0xad9   :  { %2355 = vrcp.f32 %v1275_v59 }
 0xadc   :  { %v1363_v46 = vpop.xlane.xlu1 %1362 }
 0xadd   :  { %2357 = vrcp.f32 %v1363_v46 }
 0xae0   :  { %v1451_v49 = vpop.xlane.xlu1 %1450 }
 0xae3   :  { %v2356_v2 = vpop.eup %2355 }
 0xae4   :  { %v3194_v14 = vpop.xlane.xlu1 %1186  ;;  %v1285_v41 = vmul.f32 0.25, %v2356_v2 }
 0xae6   :  { %v1289_v26 = vmul.f32 %v3114_v10, %v1285_v41 }
 0xae7   :  { %v2358_v12 = vpop.eup %2357 }
 0xae8   :  { %v1269_v1 = vpop.xlane.xlu1 %1268  ;;  %v1373_v55 = vmul.f32 0.25, %v2358_v12 }
 0xaea   :  { %v1377_v57 = vmul.f32 %v3119_v8, %v1373_v55 }
 0xaec   :  { %v1357_v34 = vpop.xlane.xlu1 %1356  ;;  %v1278_v3 = vpop.xlane.xlu0 %1277 }
 0xaed   :  { %2359 = vrcp.f32 %v1278_v3 }
 0xaf0   :  { %v1445_v15 = vpop.xlane.xlu1 %1444  ;;  %v1366_v7 = vpop.xlane.xlu0 %1365 }
 0xaf1   :  { %2361 = vrcp.f32 %v1366_v7 }
 0xaf2   :  { %2363 = vrcp.f32 %v1269_v1 }
 0xaf3   :  { %2365 = vrcp.f32 %v1357_v34 }
 0xaf4   :  { %v1540_v17 = vpop.permute.xlu1 %1539  ;;  %v1454_v63 = vpop.xlane.xlu0 %1453 }
 0xaf5   :  { %2072 = vmatprep.subr.bf16.mxu1 %v1540_v17 }
 0xaf6   :  { %2073 = vmatpush3.bf16.msra.mxu1 %v1540_v17 }
 0xaf7   :  { %v2360_v53 = vpop.eup %2359 }
 0xaf8   :  { %v1286_v50 = vmul.f32 0.25, %v2360_v53 }
 0xafa   :  { %v1290_v48 = vmul.f32 %v3141_v52, %v1286_v50 }
 0xafb   :  { %v2362_v0 = vpop.eup %2361 }
 0xafc   :  { %v2201_v25 = vpack.i.bf16 %v1290_v48, %v1289_v26  ;;  %v1374_v56 = vmul.f32 0.25, %v2362_v0  ;;  %v2364_v8 = vpop.eup %2363 }
 0xafd   :  { %v2366_v22 = vpop.eup %2365  ;;  %v1283_v58 = vmul.f32 0.25, %v2364_v8 }
 0xafe   :  { %v1378_v9 = vmul.f32 %v3149_v42, %v1374_v56  ;;  %2202 = vrot.lane.b32.xlu0 %v2201_v25, %s2425_s4  ;;  %v1371_v44 = vmul.f32 0.25, %v2366_v22 }
 0xb00   :  { %v2206_v27 = vpack.i.bf16 %v1378_v9, %v1377_v57  ;;  %v1375_v59 = vmul.f32 %v3139_v30, %v1371_v44 }
 0xb02   :  { %2207 = vrot.lane.b32.xlu0 %v2206_v27, %s2424_s22 }
 0xb04   :  { %v1190_v32 = vpop.xlane.xlu0 %1189 }
 0xb06   :  { %1545 = vrot.lane.b32.xlu0 %v2954_v54, %s2425_s4  ;;  %v1287_v54 = vmul.f32 %v3134_v11, %v1283_v58 }
 0xb08   :  { %v1272_v10 = vpop.xlane.xlu0 %1271 }
 0xb09   :  { %2367 = vrcp.f32 %v1272_v10 }
 0xb0a   :  { %2369 = vrcp.f32 %v1445_v15 }
 0xb0c   :  { %v1360_v52 = vpop.xlane.xlu0 %1359 }
 0xb0d   :  { %2371 = vrcp.f32 %v1360_v52 }
 0xb0e   :  { %2373 = vrcp.f32 %v1454_v63 }
 0xb0f   :  { %2375 = vrcp.f32 %v1451_v49 }
 0xb10   :  { %v1448_v42 = vpop.xlane.xlu0 %1447 }
 0xb11   :  { %2377 = vrcp.f32 %v1448_v42 }
 0xb13   :  { %v2368_v60 = vpop.eup %2367 }
 0xb14   :  { %v1284_v21 = vmul.f32 0.25, %v2368_v60  ;;  %v1544_v18 = vpop.permute.xlu0 %1543  ;;  %v2370_v4 = vpop.eup %2369 }
 0xb15   :  { %2074 = vmatprep.subr.bf16.mxu1 %v1544_v18  ;;  %v1459_v46 = vmul.f32 0.25, %v2370_v4 }
 0xb16   :  { %v1288_v43 = vmul.f32 %v3169_v33, %v1284_v21  ;;  %2075 = vmatpush3.bf16.msra.mxu1 %v1544_v18 }
 0xb17   :  { %v2372_v13 = vpop.eup %2371  ;;  %v1463_v33 = vmul.f32 %v3147_v24, %v1459_v46 }
 0xb18   :  { %v2211_v37 = vpack.i.bf16 %v1288_v43, %v1287_v54  ;;  %v1372_v38 = vmul.f32 0.25, %v2372_v13  ;;  %v2374_v16 = vpop.eup %2373 }
 0xb19   :  { %v2376_v51 = vpop.eup %2375  ;;  %v1462_v34 = vmul.f32 0.25, %v2374_v16 }
 0xb1a   :  { %v1376_v49 = vmul.f32 %v3173_v62, %v1372_v38  ;;  %2212 = vrot.lane.b32.xlu1 %v2211_v37, %s2425_s4  ;;  %v1461_v15 = vmul.f32 0.25, %v2376_v51 }
 0xb1b   :  { %v2378_v1 = vpop.eup %2377  ;;  %v1466_v2 = vmul.f32 %v3155_v45, %v1462_v34 }
 0xb1c   :  { %v2216_v3 = vpack.i.bf16 %v1376_v49, %v1375_v59  ;;  %v1460_v11 = vmul.f32 0.25, %v2378_v1  ;;  %v1465_v30 = vmul.f32 %v3124_v36, %v1461_v15 }
 0xb1e   :  { %v1464_v7 = vmul.f32 %v3177_v19, %v1460_v11  ;;  %2217 = vrot.lane.b32.xlu1 %v2216_v3, %s2424_s22  ;;  %v2226_v62 = vpack.i.bf16 %v1466_v2, %v1465_v30 }
 0xb20   :  { %v2221_v17 = vpack.i.bf16 %v1464_v7, %v1463_v33 }
 0xb22   :  { %2222 = vrot.lane.b32.xlu1 %v2221_v17, %s2423_s3 }
 0xb25   :  { %v1181_v24 = vpop.xlane.xlu1 %1180 }
 0xb26   :  { %2227 = vrot.lane.b32.xlu1 %v2226_v62, %s2423_s3  ;;  %2379 = vrcp.f32 %v1181_v24 }
 0xb30   :  { %v2380_v45 = vpop.eup %2379 }
 0xb31   :  { %v1195_v55 = vmul.f32 0.25, %v2380_v45 }
 0xb33   :  { %v1199_v52 = vmul.f32 %v3183_v20, %v1195_v55 }
 0xb45   :  { %v1184_v12 = vpop.xlane.xlu0 %1183 }
 0xb46   :  { %2381 = vrcp.f32 %v1184_v12 }
 0xb47   :  { %2383 = vrcp.f32 %v3194_v14 }
 0xb48   :  { %2385 = vrcp.f32 %v1190_v32 }
 0xb50   :  { %v2382_v19 = vpop.eup %2381 }
 0xb51   :  { %v2384_v26 = vpop.eup %2383  ;;  %v1196_v48 = vmul.f32 0.25, %v2382_v19 }
 0xb52   :  { %v2386_v0 = vpop.eup %2385  ;;  %v1197_v27 = vmul.f32 0.25, %v2384_v26 }
 0xb53   :  { %v1198_v10 = vmul.f32 0.25, %v2386_v0  ;;  %v1200_v8 = vmul.f32 %v3190_v6, %v1196_v48 }
 0xb54   :  { %v1201_v43 = vmul.f32 %v3129_v31, %v1197_v27 }
 0xb55   :  { %v1202_v20 = vmul.f32 %v3165_v28, %v1198_v10 }
 0xb70   :  { %v2203_v41 = vpop.permute.xlu0 %2202 }
 0xb71   :  { %v2205_v14 = vunpack.i.h.bf16 %v2203_v41  ;;  %v2204_v32 = vunpack.i.l.bf16 %v2203_v41 }
 0xb73   :  { %v1518_v16 = vsel %vm366_vm1, %v1202_v20, %v2205_v14  ;;  %v1517_v51 = vsel %vm366_vm1, %v1201_v43, %v2204_v32  ;;  %v1914_v43 = vld [vmem:[%s3333_s10] ss:$0 sm:$0xff] }
 0xb74   :  { %v2208_v53 = vpop.permute.xlu0 %2207 }
 0xb75   :  { %v2210_v18 = vunpack.i.h.bf16 %v2208_v53  ;;  %v2209_v4 = vunpack.i.l.bf16 %v2208_v53 }
 0xb77   :  { %v1521_v49 = vsel %vm731_vm3, %v1517_v51, %v2209_v4  ;;  %v1522_v1 = vsel %vm731_vm3, %v1518_v16, %v2210_v18 }
 0xb78   :  { %v1546_v50 = vpop.permute.xlu0 %1545 }
 0xb79   :  { %2076 = vmatprep.subr.bf16.mxu1 %v1546_v50 }
 0xb7a   :  { %2077 = vmatpush3.bf16.msra.mxu1 %v1546_v50 }
 0xb8c   :  { %v2213_v36 = vpop.permute.xlu1 %2212 }
 0xb8d   :  { %v2215_v56 = vunpack.i.h.bf16 %v2213_v36  ;;  %v2214_v57 = vunpack.i.l.bf16 %v2213_v36 }
 0xb8f   :  { %v1515_v22 = vsel %vm366_vm1, %v1199_v52, %v2214_v57  ;;  %v1516_v58 = vsel %vm366_vm1, %v1200_v8, %v2215_v56 }
 0xb90   :  { %v2218_v25 = vpop.permute.xlu1 %2217 }
 0xb91   :  { %v2220_v9 = vunpack.i.h.bf16 %v2218_v25  ;;  %v2219_v63 = vunpack.i.l.bf16 %v2218_v25 }
 0xb93   :  { %v1519_v54 = vsel %vm731_vm3, %v1515_v22, %v2219_v63  ;;  %v1520_v44 = vsel %vm731_vm3, %v1516_v58, %v2220_v9 }
 0xb94   :  { %v2223_v42 = vpop.permute.xlu1 %2222 }
 0xb95   :  { %v2225_v60 = vunpack.i.h.bf16 %v2223_v42  ;;  %v2224_v21 = vunpack.i.l.bf16 %v2223_v42 }
 0xb97   :  { %v1523_v6 = vsel %vm736_vm4, %v1519_v54, %v2224_v21  ;;  %v1524_v13 = vsel %vm736_vm4, %v1520_v44, %v2225_v60 }
 0xb98   :  { %v2228_v37 = vpop.permute.xlu1 %2227  ;;  %v1527_v38 = vpack.c.bf16 %v1524_v13, %v1523_v6  ;;  %v1915_v13 = vld [vmem:[%s3334_s11] ss:$0 sm:$0xff]  ;;  %s2429_s11 = smov [#allocation2]  }
 0xb99   :  { %v2230_v59 = vunpack.i.h.bf16 %v2228_v37  ;;  %v2229_v46 = vunpack.i.l.bf16 %v2228_v37  ;;  %s1879_s28 = sshll.u32 %s2429_s11, 4  ;;  %s1880_s28 = int_to_ptr.vmem [resolvable:$true] %s1879_s28 }
 0xb9a   :  { %2078 = vmatprep.mubr.bf16.mxu1 %v1527_v38  ;;  %p2400_p1 = scmp.lt.s32.totalorder %s1880_s28, %s1880_s28 }
 0xb9b   :  { %v1525_v31 = vsel %vm736_vm4, %v1521_v49, %v2229_v46  ;;  %v1526_v28 = vsel %vm736_vm4, %v1522_v1, %v2230_v59  ;;  %vm2427_vm4 = vmmov 0  }
 0xb9c   :  { %v1528_v34 = vpack.c.bf16 %v1526_v28, %v1525_v31 }
 0xb9e   :  { %2079 = vmatmul.mubr.bf16.vlgmr.msra.gmra.mrb[8].mxu1 %v1528_v34 }
 0xc71   :  { %v2080_v3 = vpop.f32.mrb[8].mxu1 }
 0xc72   :  { %v1583_v11 = vpop.f32.mrb[9].mxu1  ;;  %v1604_v17 = vsel %vm366_vm1, %v2080_v3, 0.0 }
 0xc73   :  { %v2081_v15 = vpop.f32.mrb[10].mxu1  ;;  %v1598_v33 = vsel %vm366_vm1, %v1583_v11, 0.0 }
 0xc74   :  { %1599 = vadd.xlane.f32.xlu0 %v1598_v33  ;;  %v1586_v7 = vpop.f32.mrb[11].mxu1  ;;  %v1607_v30 = vsel %vm366_vm1, %v2081_v15, 0.0 }
 0xc75   :  { %v1601_v2 = vsel %vm366_vm1, %v1586_v7, 0.0 }
 0xc76   :  { %1602 = vadd.xlane.f32.xlu1 %v1601_v2 }
 0xc78   :  { %1605 = vadd.xlane.f32.xlu0 %v1604_v17  ;;  %v1710_v17 = vld [vmem:[%s3335_s12] sm:$0xff] }
 0xc7c   :  { %1608 = vadd.xlane.f32.xlu0 %v1607_v30  ;;  %v1711_v30 = vld [vmem:[%s3335_s12 + $0x8] sm:$0xff] }
 0xd01   :  { %v1600_v62 = vpop.xlane.xlu0 %1599 }
 0xd02   :  { %v1610_v12 = vmul.f32 0.03125, %v1600_v62  ;;  %v1712_v62 = vld [vmem:[%s3335_s12 + $0x10] sm:$0xff] }
 0xd03   :  { %v1603_v41 = vpop.xlane.xlu1 %1602 }
 0xd04   :  { %v1614_v53 = vsub.f32 %v1583_v11, %v1610_v12  ;;  %v1611_v50 = vmul.f32 0.03125, %v1603_v41  ;;  %v2426_v12 = vmov 0.0|0.0   ;;  %v2113_v41 = vpack.c.bf16 %v1711_v30, %v1710_v17 }
 0xd05   :  { %v1606_v24 = vpop.xlane.xlu0 %1605  ;;  %2112 = vmatprep.subr.bf16.mxu0 %v2426_v12  ;;  %2124 = vmatprep.subr.bf16.mxu1 %v2426_v12 }
 0xd06   :  { %v1615_v45 = vsub.f32 %v1586_v7, %v1611_v50  ;;  %v1612_v19 = vmul.f32 0.03125, %v1606_v24  ;;  %v1618_v36 = vmul.f32 %v1614_v53, %v1614_v53  ;;  %v2428_v50 = vmov 0.0   ;;  %v1793_v24 = vld [vmem:[%s3337_s14] sm:$0xff]  ;;  %2114 = vmatpush3.bf16.msra.mxu0 %v2113_v41 }
 0xd07   :  { %2098 = vmatprep.mubr.msk.f32.mxu0 %vm2427_vm4, %v2428_v50  ;;  %2109 = vmatprep.mubr.msk.f32.mxu1 %vm2427_vm4, %v2428_v50 }
 0xd08   :  { %v1616_v26 = vsub.f32 %v2080_v3, %v1612_v19  ;;  %v1622_v55 = vsel %vm366_vm1, %v1618_v36, 0.0  ;;  %v1619_v48 = vmul.f32 %v1615_v45, %v1615_v45  ;;  %v1794_v19 = vld [vmem:[%s3337_s14 + $0x8] sm:$0xff]  ;;  %2115 = vmatprep.subr.bf16.mxu0 %v2426_v12  ;;  %v1714_v36 = vld [vmem:[%s3335_s12 + $0x20] sm:$0xff] }
 0xd09   :  { %v1609_v0 = vpop.xlane.xlu0 %1608  ;;  %1623 = vadd.xlane.f32.xlu1 %v1622_v55  ;;  %v2125_v55 = vpack.c.bf16 %v1794_v19, %v1793_v24 }
 0xd0a   :  { %v1613_v25 = vmul.f32 0.03125, %v1609_v0  ;;  %v1625_v56 = vsel %vm366_vm1, %v1619_v48, 0.0  ;;  %v1620_v57 = vmul.f32 %v1616_v26, %v1616_v26  ;;  %v1716_v0 = vld [vmem:[%s3335_s12 + $0x30] sm:$0xff] }
 0xd0b   :  { %1626 = vadd.xlane.f32.xlu0 %v1625_v56  ;;  %2126 = vmatpush3.bf16.msra.mxu1 %v2125_v55 }
 0xd0c   :  { %v1617_v9 = vsub.f32 %v2081_v15, %v1613_v25  ;;  %v1628_v63 = vsel %vm366_vm1, %v1620_v57, 0.0  ;;  %2127 = vmatprep.subr.bf16.mxu1 %v2426_v12  ;;  %v1717_v25 = vld [vmem:[%s3335_s12 + $0x38] sm:$0xff] }
 0xd0d   :  { %1629 = vadd.xlane.f32.xlu1 %v1628_v63  ;;  %v2122_v56 = vpack.c.bf16 %v1717_v25, %v1716_v0 }
 0xd0e   :  { %v1621_v27 = vmul.f32 %v1617_v9, %v1617_v9 }
 0xd10   :  { %v1631_v10 = vsel %vm366_vm1, %v1621_v27, 0.0 }
 0xd11   :  { %1632 = vadd.xlane.f32.xlu0 %v1631_v10 }
 0xd96   :  { %v1624_v52 = vpop.xlane.xlu1 %1623 }
 0xd97   :  { %v1634_v8 = vmul.f32 0.03125, %v1624_v52 }
 0xd98   :  { %v1627_v14 = vpop.xlane.xlu0 %1626 }
 0xd99   :  { %v1638_v32 = vadd.f32 1e-05, %v1634_v8  ;;  %v1635_v42 = vmul.f32 0.03125, %v1627_v14 }
 0xd9a   :  { %v1630_v22 = vpop.xlane.xlu1 %1629 }
 0xd9b   :  { %2387 = vrsqrt.f32 %v1638_v32  ;;  %v1639_v58 = vadd.f32 1e-05, %v1635_v42  ;;  %v1636_v60 = vmul.f32 0.03125, %v1630_v22 }
 0xd9d   :  { %2389 = vrsqrt.f32 %v1639_v58  ;;  %v1640_v21 = vadd.f32 1e-05, %v1636_v60 }
 0xd9e   :  { %v1633_v18 = vpop.xlane.xlu0 %1632 }
 0xd9f   :  { %2391 = vrsqrt.f32 %v1640_v21  ;;  %v1637_v4 = vmul.f32 0.03125, %v1633_v18 }
 0xda1   :  { %v1641_v54 = vadd.f32 1e-05, %v1637_v4 }
 0xda3   :  { %2393 = vrsqrt.f32 %v1641_v54 }
 0xda5   :  { %v2388_v44 = vpop.eup %2387 }
 0xda6   :  { %v1646_v20 = vmul.f32 %v2388_v44, %v1614_v53  ;;  %v1713_v53 = vld [vmem:[%s3335_s12 + $0x18] sm:$0xff]  ;;  %v1718_v44 = vld [vmem:[%s3336_s13] sm:$0x1]  ;;  %s2399_s13 = scalar_lea.vmem %s1880_s28, 32 }
 0xda7   :  { %v2390_v6 = vpop.eup %2389 }
 0xda8   :  { %v1657_v37 = vmul.f32 %v1914_v43, %v1646_v20  ;;  %v1647_v38 = vmul.f32 %v2390_v6, %v1615_v45  ;;  %v2116_v45 = vpack.c.bf16 %v1713_v53, %v1712_v62 }
 0xda9   :  { %v2392_v16 = vpop.eup %2391 }
 0xdaa   :  { %v1668_v51 = vadd.f32 %v1915_v13, %v1657_v37  ;;  %v1658_v59 = vmul.f32 %v1914_v43, %v1647_v38  ;;  %v1648_v46 = vmul.f32 %v2392_v16, %v1616_v26  ;;  %v1715_v26 = vld [vmem:[%s3335_s12 + $0x28] sm:$0xff]  ;;  %2117 = vmatpush3.bf16.msra.mxu0 %v2116_v45  ;;  %v1797_v37 = vld [vmem:[%s3338_s15] sm:$0x1] }
 0xdab   :  { %v2119_v48 = vpack.c.bf16 %v1715_v26, %v1714_v36  ;;  %2118 = vmatprep.subr.bf16.mxu0 %v2426_v12 }
 0xdac   :  { %v1672_v49 = vmax.f32 %v1668_v51, 0.0  ;;  %v1669_v1 = vadd.f32 %v1915_v13, %v1658_v59  ;;  %v1659_v31 = vmul.f32 %v1914_v43, %v1648_v46 }
 0xdad   :  { %v2394_v28 = vpop.eup %2393 }
 0xdae   :  { %1680 = vrot.lane.b32.xlu1 %v1672_v49, %s2425_s4  ;;  %v1673_v34 = vmax.f32 %v1669_v1, 0.0  ;;  %v1670_v3 = vadd.f32 %v1915_v13, %v1659_v31  ;;  %v1649_v11 = vmul.f32 %v2394_v28, %v1617_v9  ;;  %2120 = vmatpush3.bf16.msra.mxu0 %v2119_v48 }
 0xdaf   :  { %2121 = vmatprep.subr.bf16.mxu0 %v2426_v12 }
 0xdb0   :  { %1682 = vrot.lane.b32.xlu0 %v1673_v34, %s2425_s4  ;;  %v1674_v15 = vmax.f32 %v1670_v3, 0.0  ;;  %v1660_v33 = vmul.f32 %v1914_v43, %v1649_v11 }
 0xdb2   :  { %1684 = vrot.lane.b32.xlu1 %v1674_v15, %s2425_s4  ;;  %v1671_v7 = vadd.f32 %v1915_v13, %v1660_v33  ;;  %2123 = vmatpush3.bf16.msra.mxu0 %v2122_v56 }
 0xdb4   :  { %v1675_v2 = vmax.f32 %v1671_v7, 0.0 }
 0xdb6   :  { %1686 = vrot.lane.b32.xlu1 %v1675_v2, %s2425_s4 }
 0xe20   :  { %v1681_v57 = vpop.permute.xlu1 %1680 }
 0xe21   :  { %v1692_v9 = vsel %vm366_vm1, %v887_v47, %v1681_v57 }
 0xe22   :  { %v1683_v63 = vpop.permute.xlu0 %1682  ;;  %v1696_v10 = vsel %vm731_vm3, %v1692_v9, 0.0 }
 0xe23   :  { %v1693_v27 = vsel %vm366_vm1, %v888_v35, %v1683_v63 }
 0xe24   :  { %v1697_v52 = vsel %vm731_vm3, %v1693_v27, 0.0  ;;  %v1685_v8 = vpop.permute.xlu1 %1684 }
 0xe25   :  { %v1698_v14 = vadd.f32 %v1697_v52, %v1696_v10  ;;  %v1694_v32 = vsel %vm366_vm1, %v889_v23, %v1685_v8  ;;  %v1795_v23 = vld [vmem:[%s3337_s14 + $0x10] sm:$0xff]  ;;  %s2395_s14 = scalar_lea.vmem %s1880_s28, 16 }
 0xe26   :  { %v1699_v42 = vsel %vm731_vm3, %v1694_v32, 0.0  ;;  %p2396_p0 = scmp.ne.s32.totalorder %s1880_s28, %s2395_s14  ;;  %p2401_p2 = scmp.lt.s32.totalorder %s2399_s13, %s2395_s14 }
 0xe27   :  { %v1700_v22 = vadd.f32 %v1699_v42, %v1698_v14 }
 0xe28   :  { %v1687_v61 = vpop.permute.xlu1 %1686  ;;  %p2402_p3 = por %p2401_p2, %p2400_p1 }
 0xe29   :  { %v1695_v39 = vsel %vm366_vm1, %v890_v40, %v1687_v61  ;;  %v2128_v40 = vpack.c.bf16 %v1796_v29, %v1795_v23 }
 0xe2a   :  { %v1701_v47 = vsel %vm731_vm3, %v1695_v39, 0.0  ;;  %p2403_p4 = pnand %p2402_p3, %p2396_p0 }
 0xe2b   :  { %v1702_v35 = vadd.f32 %v1701_v47, %v1700_v22  ;;  %2129 = vmatpush3.bf16.msra.mxu1 %v2128_v40 }
 0xe2d   :  { %v1703_v58 = vrot.slane %v1702_v35, 4 }
 0xe2f   :  { %v1704_v60 = vadd.f32 %v1703_v58, %v1702_v35 }
 0xe31   :  { %v1705_v21 = vrot.slane %v1704_v60, 2 }
 0xe33   :  { %v1706_v18 = vadd.f32 %v1705_v21, %v1704_v60 }
 0xe35   :  { %v1707_v4 = vrot.slane %v1706_v18, 1 }
 0xe37   :  { %v1708_v54 = vadd.f32 %v1707_v4, %v1706_v18 }
 0xe39   :  { %v1709_v5 = vmul.f32 0.03125, %v1708_v54 }
 0xe3b   :  { %2099 = vmatmul.mubr.msk.f32.vlgmr.msra.gmra.mrb[12].mxu0 %vm731_vm3, %v1709_v5  ;;  %vm1871_vm3 = vcmask 24576  }
 0xf0e   :  { %v1788_v43 = vpop.f32.mrb[12].mxu0 }
 0xf0f   :  { %v1789_v20 = vadd.f32 %v1788_v43, %v1718_v44  ;;  %v2100_v6 = vpop.f32.mrb[13].mxu0 }
 0xf11   :  { %v1792_v13 = vmax.f32 %v1789_v20, 0.0 }
 0xf13   :  { %2110 = vmatmul.mubr.msk.f32.vlgmr.msra.gmra.mrb[12].mxu1 %vm366_vm1, %v1792_v13 }
 0xfe6   :  { %v1867_v38 = vpop.f32.mrb[12].mxu1 }
 0xfe7   :  { %v1868_v16 = vadd.f32 %v1867_v38, %v1797_v37  ;;  %v2111_v51 = vpop.f32.mrb[13].mxu1 }
 0xfe9   :  { %1872 = vst.msk [vmem:[#allocation2] sm:$0x1] %vm1871_vm3, %v1868_v16 }
 0xfea   :  { %2406 = shalt.err (!%p2403_p4)
}
 0xfeb   :  { %s2407_s15 = scalar_lea.hbm %s3339_s16, 16 }
 0xfec   :  { %p2408_p5 = scmp.ne.s32.totalorder %s3339_s16, %s2407_s15  ;;  %p2411_p6 = scmp.lt.u32.totalorder %s2407_s15, %s3339_s16 }
 0xfee   :  { %p2413_p7 = pnand %p2411_p6, %p2408_p5 }
 0xff0   :  { %2416 = shalt.err (!%p2413_p7)
}
 0xff1   :  { %1882 = dma.vmem_to_hbm [thread:$0]  %s1880_s28, 16, %s3339_s16, [#allocation3]  }
 0xff2   :  { %2417 = dma.done.wait [#allocation3], 16  }
 0xff3   :  { %2418 = vsyncadd [#allocation3], 4294967280 }
 0xff4   :  { %1886 = vsyncpa [#allocation3], 1 }

</bundles_post_ra>
